<compile_context>
chip_gen: v5e
topology: v5e:2x2
jax: 0.10.0
libtpu: 0.0.40
codegen_flags: <defaults>
</compile_context>

<pallas_src>
import jax
import jax.numpy as jnp
from jax import lax
from jax.experimental import pallas as pl
from jax.experimental.pallas import tpu as pltpu


# ----------------------------- configuration ------------------------------
B  = 4          # real batch
BP = 8          # padded batch (sublane multiple)
T  = 8          # max utterance length (short ctx)
V  = 64         # vocab size
E  = 32         # embed_size
H  = 32         # utt_cell_size (unidirectional GRU)
BS = 16         # bs_size
DB = 8          # db_size
Y  = 4          # y_size
K  = 8          # k_size
YK = Y * K      # 32 (== H in this config; both packed buffers are 32 lanes wide)
IN_DIM = BS + DB + H

# packed weight layouts (row offsets, all sublane(8)-aligned)
#   w96 : (104, 3H) = [ gi_table (V) | w_hh (H) | b_hh (1) | pad ]
GI_OFF, WHH_OFF, BHH_OFF, W96_ROWS = 0, V, V + H, 104
#   w32 : (120, 32) = [ key_w (H) | key_b | query_w | query_b | p_w (IN_DIM) | p_b | pad ]
KW_OFF, KB_OFF, QW_OFF, QB_OFF = 0, 32, 40, 48
PW_OFF, PB_OFF, W32_ROWS = 56, 56 + IN_DIM, 120

# packed output layout: (BP, 128) = [ z (YK) | log_qy (YK) | joint_logpz (1) | pad ]
Z_OFF, LQ_OFF, JL_OFF, OUT_W = 0, YK, 2 * YK, 128


# ------------------------------- kernel -----------------------------------
def actor_kernel(tok_ref,    # (T*BP, 1) int32, time-major flat token ids
                 bs_ref,     # (BP, BS)  f32
                 db_ref,     # (BP, DB)  f32
                 w96_ref,    # (W96_ROWS, 3H) f32 packed
                 w32_ref,    # (W32_ROWS, 32) f32 packed
                 out_ref):   # (BP, OUT_W) f32 packed output
    f32 = jnp.float32

    # ---- embedding + GRU input projection: one-hot gather off gi_table ----
    tok = tok_ref[...]                                              # (T*BP, 1)
    vocab_iota = lax.broadcasted_iota(jnp.int32, (T * BP, V), 1)
    onehot = (vocab_iota == tok).astype(f32)                        # (T*BP, V)
    gi_all = jnp.dot(onehot, w96_ref[GI_OFF:GI_OFF + V, :],
                     preferred_element_type=f32)                    # (T*BP, 3H), b_ih folded in

    w_hh    = w96_ref[WHH_OFF:WHH_OFF + H, :]                       # (H, 3H)
    b_hh    = w96_ref[BHH_OFF:BHH_OFF + 1, :]                       # (1, 3H)
    key_w   = w32_ref[KW_OFF:KW_OFF + H, :]                         # (H, H)
    key_b   = w32_ref[KB_OFF:KB_OFF + 1, :]                         # (1, H)
    query_w = w32_ref[QW_OFF:QW_OFF + 1, :]                         # (1, H)
    query_b = w32_ref[QB_OFF:QB_OFF + 1, 0:1]                       # (1, 1)

    # ---- unrolled GRU recurrence (PyTorch nn.GRU gate order r, z, n) ------
    # attention scores computed per step on live values (no scratch, no reshape)
    h = jnp.zeros((BP, H), f32)
    hs, scores = [], []
    for t in range(T):                                              # static -> fully unrolled
        gi = gi_all[t * BP:(t + 1) * BP, :]                         # (BP, 3H)
        gh = jnp.dot(h, w_hh, preferred_element_type=f32) + b_hh    # only matmul on serial path
        r  = jax.nn.sigmoid(gi[:, 0:H]     + gh[:, 0:H])
        zg = jax.nn.sigmoid(gi[:, H:2 * H] + gh[:, H:2 * H])
        n  = jnp.tanh(gi[:, 2 * H:3 * H] + r * gh[:, 2 * H:3 * H])
        h  = (1.0 - zg) * n + zg * h
        hs.append(h)
        fc1 = jnp.tanh(jnp.dot(h, key_w, preferred_element_type=f32) + key_b)
        scores.append(jnp.sum(fc1 * query_w, axis=-1, keepdims=True) + query_b)   # (BP, 1)

    # ---- attention softmax over time, weighted sum of hidden states -------
    m = scores[0]
    for t in range(1, T):
        m = jnp.maximum(m, scores[t])
    es = [jnp.exp(s - m) for s in scores]
    denom = es[0]
    for t in range(1, T):
        denom = denom + es[t]
    inv = pl.reciprocal(denom, approx=True)                         # EUP slot, otherwise idle
    utt = es[0] * inv * hs[0]
    for t in range(1, T):
        utt = utt + es[t] * inv * hs[t]                             # (BP, H) utt_summary

    # ---- Hidden2Discrete: Linear(BS+DB+H -> Y*K) without lane concat ------
    logits = (jnp.dot(bs_ref[...], w32_ref[PW_OFF:PW_OFF + BS, :],
                      preferred_element_type=f32)
              + jnp.dot(db_ref[...], w32_ref[PW_OFF + BS:PW_OFF + BS + DB, :],
                        preferred_element_type=f32)
              + jnp.dot(utt, w32_ref[PW_OFF + BS + DB:PW_OFF + IN_DIM, :],
                        preferred_element_type=f32)
              + w32_ref[PB_OFF:PB_OFF + 1, :])                      # (BP, Y*K)

    # ---- per-(b, y) log-softmax over k, argmax one-hot, joint log-prob ----
    lg = logits.reshape(BP, Y, K)
    lmax = jnp.max(lg, axis=-1, keepdims=True)
    lse = lmax + jnp.log(jnp.sum(jnp.exp(lg - lmax), axis=-1, keepdims=True))
    log_qy = lg - lse                                               # (BP, Y, K)
    best = jnp.max(log_qy, axis=-1, keepdims=True)                  # log_qy at argmax
    kio = lax.broadcasted_iota(jnp.int32, (BP, Y, K), 2)
    first = jnp.min(jnp.where(log_qy >= best, kio, K), axis=-1, keepdims=True)
    z = (kio == first).astype(f32)                                  # one-hot, first-max tie-break
    joint = jnp.sum(best, axis=1)                                   # (BP, 1)

    # ---- single lane-dense packed output (one (8,128) f32 vreg / DMA) -----
    out_ref[...] = jnp.zeros((BP, OUT_W), f32)
    out_ref[:, Z_OFF:Z_OFF + YK]   = z.reshape(BP, YK)
    out_ref[:, LQ_OFF:LQ_OFF + YK] = log_qy.reshape(BP, YK)
    out_ref[:, JL_OFF:JL_OFF + 1]  = joint


# ------------------------------ wrapper ------------------------------------
def actor_forward(tokens, bs_label, db_label, w96, w32):
    """tokens (B,T) int32, bs_label (B,BS) f32, db_label (B,DB) f32.

    Returns (joint_logpz (B,), sample_z (B*Y,K), log_qy (B*Y,K)); the PyTorch
    Actor.forward returns the first two.
    """
    tok_p = jnp.zeros((BP, T), jnp.int32).at[:B].set(tokens)
    tok_tm = tok_p.T.reshape(T * BP, 1)                  # time-major flat ids (tiny int transpose)
    bs_p = jnp.zeros((BP, BS), jnp.float32).at[:B].set(bs_label)
    db_p = jnp.zeros((BP, DB), jnp.float32).at[:B].set(db_label)

    vmem = pl.BlockSpec(memory_space=pltpu.MemorySpace.VMEM)
    out = pl.pallas_call(
        actor_kernel,
        out_shape=jax.ShapeDtypeStruct((BP, OUT_W), jnp.float32),
        in_specs=[vmem] * 5,
        out_specs=vmem,
    )(tok_tm, bs_p, db_p, w96, w32)

    sample_z = out[:B, Z_OFF:Z_OFF + YK].reshape(B * Y, K)
    log_qy   = out[:B, LQ_OFF:LQ_OFF + YK].reshape(B * Y, K)
    joint_logpz = out[:B, JL_OFF]
    return joint_logpz, sample_z, log_qy


def init_params(key):
    ks = jax.random.split(key, 12)
    s = 0.1
    return {
        "embedding": s * jax.random.normal(ks[0], (V, E), jnp.float32),
        "w_ih":      s * jax.random.normal(ks[1], (E, 3 * H), jnp.float32),
        "w_hh":      s * jax.random.normal(ks[2], (H, 3 * H), jnp.float32),
        "b_ih":      s * jax.random.normal(ks[3], (1, 3 * H), jnp.float32),
        "b_hh":      s * jax.random.normal(ks[4], (1, 3 * H), jnp.float32),
        "key_w":     s * jax.random.normal(ks[5], (H, H), jnp.float32),
        "key_b":     s * jax.random.normal(ks[6], (1, H), jnp.float32),
        "query_w":   s * jax.random.normal(ks[7], (1, H), jnp.float32),
        "query_b":   s * jax.random.normal(ks[8], (1, 1), jnp.float32),
        "p_w":       s * jax.random.normal(ks[9], (IN_DIM, YK), jnp.float32),
        "p_b":       s * jax.random.normal(ks[10], (1, YK), jnp.float32),
    }


def pack_params(p):
    """Pre-pack all weights (once, at init time) into two lane-dense f32 buffers."""
    gi_table = p["embedding"] @ p["w_ih"] + p["b_ih"]     # fold embed + GRU input proj + b_ih
    w96 = jnp.zeros((W96_ROWS, 3 * H), jnp.float32)
    w96 = w96.at[GI_OFF:GI_OFF + V].set(gi_table)
    w96 = w96.at[WHH_OFF:WHH_OFF + H].set(p["w_hh"])
    w96 = w96.at[BHH_OFF].set(p["b_hh"][0])

    w32 = jnp.zeros((W32_ROWS, YK), jnp.float32)
    w32 = w32.at[KW_OFF:KW_OFF + H].set(p["key_w"])
    w32 = w32.at[KB_OFF].set(p["key_b"][0])
    w32 = w32.at[QW_OFF].set(p["query_w"][0])
    w32 = w32.at[QB_OFF, 0].set(p["query_b"][0, 0])
    w32 = w32.at[PW_OFF:PW_OFF + IN_DIM].set(p["p_w"])
    w32 = w32.at[PB_OFF].set(p["p_b"][0])
    return w96, w32


def reference_forward(tokens, bs_label, db_label, p):
    """Pure-JAX reference of the same deterministic forward pass."""
    emb = p["embedding"][tokens]                           # (B, T, E)
    h = jnp.zeros((B, H), jnp.float32)
    hs = []
    for t in range(T):
        gi = emb[:, t, :] @ p["w_ih"] + p["b_ih"]
        gh = h @ p["w_hh"] + p["b_hh"]
        r  = jax.nn.sigmoid(gi[:, :H] + gh[:, :H])
        zg = jax.nn.sigmoid(gi[:, H:2 * H] + gh[:, H:2 * H])
        n  = jnp.tanh(gi[:, 2 * H:] + r * gh[:, 2 * H:])
        h  = (1.0 - zg) * n + zg * h
        hs.append(h)
    eo = jnp.stack(hs, axis=0)                             # (T, B, H)
    fc1 = jnp.tanh(eo @ p["key_w"] + p["key_b"])
    sc = jnp.sum(fc1 * p["query_w"], axis=-1) + p["query_b"][0, 0]
    attn = jax.nn.softmax(sc, axis=0)
    utt = jnp.sum(attn[:, :, None] * eo, axis=0)
    enc_last = jnp.concatenate([bs_label, db_label, utt], axis=1)
    logits = (enc_last @ p["p_w"] + p["p_b"]).reshape(B * Y, K)
    log_qy = jax.nn.log_softmax(logits, axis=-1)
    idx = jnp.argmax(log_qy, axis=-1)
    sample_z = jax.nn.one_hot(idx, K, dtype=jnp.float32)
    joint = jnp.sum(jnp.take_along_axis(log_qy, idx[:, None], axis=-1).reshape(B, Y), axis=1)
    return joint, sample_z, log_qy


if __name__ == "__main__":
    key = jax.random.PRNGKey(0)
    kp, kt, kb, kd = jax.random.split(key, 4)

    params = init_params(kp)
    w96, w32 = pack_params(params)

    tokens   = jax.random.randint(kt, (B, T), 0, V, dtype=jnp.int32)   # short-ctx utterances
    bs_label = jax.random.uniform(kb, (B, BS), jnp.float32)            # belief state
    db_label = jax.random.uniform(kd, (B, DB), jnp.float32)            # db features

    joint_logpz, sample_z, log_qy = jax.jit(actor_forward)(tokens, bs_label, db_label, w96, w32)
    jax.block_until_ready((joint_logpz, sample_z, log_qy))

    # structural sanity
    assert joint_logpz.shape == (B,) and sample_z.shape == (B * Y, K) and log_qy.shape == (B * Y, K)
    assert bool(jnp.all(jnp.abs(jnp.sum(sample_z, axis=1) - 1.0) < 1e-6))          # one-hot rows
    assert bool(jnp.all(jnp.abs(jnp.sum(jnp.exp(log_qy), axis=1) - 1.0) < 1e-4))   # valid log-probs
    assert bool(jnp.all(jnp.argmax(sample_z, axis=1) == jnp.argmax(log_qy, axis=1)))

    # numerical check against the pure-JAX reference
    ref_joint, _, ref_log_qy = reference_forward(tokens, bs_label, db_label, params)
    assert bool(jnp.allclose(log_qy, ref_log_qy, atol=1e-2))
    assert bool(jnp.allclose(joint_logpz, ref_joint, atol=1e-2))

    print("KERNEL_OK")
</pallas_src>

<mosaic_0001>
module attributes {stable_mosaic.version = 11 : i64} {
  func.func @actor_kernel(%arg0: memref<64x1xi32, #tpu.memory_space<vmem>>, %arg1: memref<8x16xf32, #tpu.memory_space<vmem>>, %arg2: memref<8x8xf32, #tpu.memory_space<vmem>>, %arg3: memref<104x96xf32, #tpu.memory_space<vmem>>, %arg4: memref<120x32xf32, #tpu.memory_space<vmem>>, %arg5: memref<8x128xf32, #tpu.memory_space<vmem>>) attributes {dimension_semantics = [], scalar_prefetch = 0 : i64, scratch_operands = 0 : i64, tpu.core_type = #tpu.core_type<tc>} {
    %c0 = arith.constant 0 : index
    %c0_0 = arith.constant 0 : index
    %0 = vector.load %arg0[%c0, %c0_0] : memref<64x1xi32, #tpu.memory_space<vmem>>, vector<64x1xi32>
    %1 = tpu.iota {dimensions = array<i32: 1>} : vector<64x64xi32>
    %2 = vector.broadcast %0 : vector<64x1xi32> to vector<64x64xi32>
    %3 = arith.cmpi eq, %1, %2 : vector<64x64xi32>
    %4 = arith.extui %3 : vector<64x64xi1> to vector<64x64xi32>
    %5 = arith.sitofp %4 : vector<64x64xi32> to vector<64x64xf32>
    %c0_1 = arith.constant 0 : index
    %c0_2 = arith.constant 0 : index
    %6 = vector.load %arg3[%c0_1, %c0_2] : memref<104x96xf32, #tpu.memory_space<vmem>>, vector<64x96xf32>
    %cst = arith.constant dense<0.000000e+00> : vector<64x96xf32>
    %7 = tpu.matmul %5, %6, %cst {dimension_numbers = #tpu.dot_dimension_numbers<[1], [0], [0], [1], [0, 0, 1, 1], [], []>} : vector<64x64xf32>, vector<64x96xf32>, vector<64x96xf32> -> vector<64x96xf32>
    %c64 = arith.constant 64 : index
    %c0_3 = arith.constant 0 : index
    %8 = vector.load %arg3[%c64, %c0_3] : memref<104x96xf32, #tpu.memory_space<vmem>>, vector<32x96xf32>
    %c96 = arith.constant 96 : index
    %c0_4 = arith.constant 0 : index
    %9 = vector.load %arg3[%c96, %c0_4] : memref<104x96xf32, #tpu.memory_space<vmem>>, vector<1x96xf32>
    %c0_5 = arith.constant 0 : index
    %c0_6 = arith.constant 0 : index
    %10 = vector.load %arg4[%c0_5, %c0_6] : memref<120x32xf32, #tpu.memory_space<vmem>>, vector<32x32xf32>
    %c32 = arith.constant 32 : index
    %c0_7 = arith.constant 0 : index
    %11 = vector.load %arg4[%c32, %c0_7] : memref<120x32xf32, #tpu.memory_space<vmem>>, vector<1x32xf32>
    %c40 = arith.constant 40 : index
    %c0_8 = arith.constant 0 : index
    %12 = vector.load %arg4[%c40, %c0_8] : memref<120x32xf32, #tpu.memory_space<vmem>>, vector<1x32xf32>
    %c48 = arith.constant 48 : index
    %c0_9 = arith.constant 0 : index
    %13 = vector.load %arg4[%c48, %c0_9] : memref<120x32xf32, #tpu.memory_space<vmem>>, vector<1x1xf32>
    %cst_10 = arith.constant 0.000000e+00 : f32
    %14 = vector.broadcast %cst_10 : f32 to vector<8x32xf32>
    %15 = vector.extract_strided_slice %7 {offsets = [0, 0], sizes = [8, 96], strides = [1, 1]} : vector<64x96xf32> to vector<8x96xf32>
    %cst_11 = arith.constant dense<0.000000e+00> : vector<8x96xf32>
    %16 = tpu.matmul %14, %8, %cst_11 {dimension_numbers = #tpu.dot_dimension_numbers<[1], [0], [0], [1], [0, 0, 1, 1], [], []>} : vector<8x32xf32>, vector<32x96xf32>, vector<8x96xf32> -> vector<8x96xf32>
    %17 = vector.broadcast %9 : vector<1x96xf32> to vector<8x96xf32>
    %18 = arith.addf %16, %17 : vector<8x96xf32>
    %19 = vector.extract_strided_slice %15 {offsets = [0, 0], sizes = [8, 32], strides = [1, 1]} : vector<8x96xf32> to vector<8x32xf32>
    %20 = vector.extract_strided_slice %18 {offsets = [0, 0], sizes = [8, 32], strides = [1, 1]} : vector<8x96xf32> to vector<8x32xf32>
    %21 = arith.addf %19, %20 : vector<8x32xf32>
    %22 = arith.negf %21 : vector<8x32xf32>
    %23 = math.exp %22 : vector<8x32xf32>
    %cst_12 = arith.constant 1.000000e+00 : f32
    %24 = vector.broadcast %cst_12 : f32 to vector<8x32xf32>
    %25 = arith.addf %24, %23 : vector<8x32xf32>
    %26 = arith.divf %24, %25 : vector<8x32xf32>
    %27 = vector.extract_strided_slice %15 {offsets = [0, 32], sizes = [8, 32], strides = [1, 1]} : vector<8x96xf32> to vector<8x32xf32>
    %28 = vector.extract_strided_slice %18 {offsets = [0, 32], sizes = [8, 32], strides = [1, 1]} : vector<8x96xf32> to vector<8x32xf32>
    %29 = arith.addf %27, %28 : vector<8x32xf32>
    %30 = arith.negf %29 : vector<8x32xf32>
    %31 = math.exp %30 : vector<8x32xf32>
    %cst_13 = arith.constant 1.000000e+00 : f32
    %32 = vector.broadcast %cst_13 : f32 to vector<8x32xf32>
    %33 = arith.addf %32, %31 : vector<8x32xf32>
    %34 = arith.divf %32, %33 : vector<8x32xf32>
    %35 = vector.extract_strided_slice %15 {offsets = [0, 64], sizes = [8, 32], strides = [1, 1]} : vector<8x96xf32> to vector<8x32xf32>
    %36 = vector.extract_strided_slice %18 {offsets = [0, 64], sizes = [8, 32], strides = [1, 1]} : vector<8x96xf32> to vector<8x32xf32>
    %37 = arith.mulf %26, %36 : vector<8x32xf32>
    %38 = arith.addf %35, %37 : vector<8x32xf32>
    %39 = math.tanh %38 : vector<8x32xf32>
    %cst_14 = arith.constant 1.000000e+00 : f32
    %40 = vector.broadcast %cst_14 : f32 to vector<8x32xf32>
    %41 = arith.subf %40, %34 : vector<8x32xf32>
    %42 = arith.mulf %41, %39 : vector<8x32xf32>
    %43 = arith.mulf %34, %14 : vector<8x32xf32>
    %44 = arith.addf %42, %43 : vector<8x32xf32>
    %cst_15 = arith.constant dense<0.000000e+00> : vector<8x32xf32>
    %45 = tpu.matmul %44, %10, %cst_15 {dimension_numbers = #tpu.dot_dimension_numbers<[1], [0], [0], [1], [0, 0, 1, 1], [], []>} : vector<8x32xf32>, vector<32x32xf32>, vector<8x32xf32> -> vector<8x32xf32>
    %46 = vector.broadcast %11 : vector<1x32xf32> to vector<8x32xf32>
    %47 = arith.addf %45, %46 : vector<8x32xf32>
    %48 = math.tanh %47 : vector<8x32xf32>
    %49 = vector.broadcast %12 : vector<1x32xf32> to vector<8x32xf32>
    %50 = arith.mulf %48, %49 : vector<8x32xf32>
    %cst_16 = arith.constant dense<0.000000e+00> : vector<8xf32>
    %51 = vector.multi_reduction <add>, %50, %cst_16 [1] : vector<8x32xf32> to vector<8xf32>
    %52 = vector.shape_cast %51 : vector<8xf32> to vector<8x1xf32>
    %53 = vector.broadcast %13 : vector<1x1xf32> to vector<8x1xf32>
    %54 = arith.addf %52, %53 : vector<8x1xf32>
    %55 = vector.extract_strided_slice %7 {offsets = [8, 0], sizes = [8, 96], strides = [1, 1]} : vector<64x96xf32> to vector<8x96xf32>
    %cst_17 = arith.constant dense<0.000000e+00> : vector<8x96xf32>
    %56 = tpu.matmul %44, %8, %cst_17 {dimension_numbers = #tpu.dot_dimension_numbers<[1], [0], [0], [1], [0, 0, 1, 1], [], []>} : vector<8x32xf32>, vector<32x96xf32>, vector<8x96xf32> -> vector<8x96xf32>
    %57 = vector.broadcast %9 : vector<1x96xf32> to vector<8x96xf32>
    %58 = arith.addf %56, %57 : vector<8x96xf32>
    %59 = vector.extract_strided_slice %55 {offsets = [0, 0], sizes = [8, 32], strides = [1, 1]} : vector<8x96xf32> to vector<8x32xf32>
    %60 = vector.extract_strided_slice %58 {offsets = [0, 0], sizes = [8, 32], strides = [1, 1]} : vector<8x96xf32> to vector<8x32xf32>
    %61 = arith.addf %59, %60 : vector<8x32xf32>
    %62 = arith.negf %61 : vector<8x32xf32>
    %63 = math.exp %62 : vector<8x32xf32>
    %cst_18 = arith.constant 1.000000e+00 : f32
    %64 = vector.broadcast %cst_18 : f32 to vector<8x32xf32>
    %65 = arith.addf %64, %63 : vector<8x32xf32>
    %66 = arith.divf %64, %65 : vector<8x32xf32>
    %67 = vector.extract_strided_slice %55 {offsets = [0, 32], sizes = [8, 32], strides = [1, 1]} : vector<8x96xf32> to vector<8x32xf32>
    %68 = vector.extract_strided_slice %58 {offsets = [0, 32], sizes = [8, 32], strides = [1, 1]} : vector<8x96xf32> to vector<8x32xf32>
    %69 = arith.addf %67, %68 : vector<8x32xf32>
    %70 = arith.negf %69 : vector<8x32xf32>
    %71 = math.exp %70 : vector<8x32xf32>
    %cst_19 = arith.constant 1.000000e+00 : f32
    %72 = vector.broadcast %cst_19 : f32 to vector<8x32xf32>
    %73 = arith.addf %72, %71 : vector<8x32xf32>
    %74 = arith.divf %72, %73 : vector<8x32xf32>
    %75 = vector.extract_strided_slice %55 {offsets = [0, 64], sizes = [8, 32], strides = [1, 1]} : vector<8x96xf32> to vector<8x32xf32>
    %76 = vector.extract_strided_slice %58 {offsets = [0, 64], sizes = [8, 32], strides = [1, 1]} : vector<8x96xf32> to vector<8x32xf32>
    %77 = arith.mulf %66, %76 : vector<8x32xf32>
    %78 = arith.addf %75, %77 : vector<8x32xf32>
    %79 = math.tanh %78 : vector<8x32xf32>
    %cst_20 = arith.constant 1.000000e+00 : f32
    %80 = vector.broadcast %cst_20 : f32 to vector<8x32xf32>
    %81 = arith.subf %80, %74 : vector<8x32xf32>
    %82 = arith.mulf %81, %79 : vector<8x32xf32>
    %83 = arith.mulf %74, %44 : vector<8x32xf32>
    %84 = arith.addf %82, %83 : vector<8x32xf32>
    %cst_21 = arith.constant dense<0.000000e+00> : vector<8x32xf32>
    %85 = tpu.matmul %84, %10, %cst_21 {dimension_numbers = #tpu.dot_dimension_numbers<[1], [0], [0], [1], [0, 0, 1, 1], [], []>} : vector<8x32xf32>, vector<32x32xf32>, vector<8x32xf32> -> vector<8x32xf32>
    %86 = vector.broadcast %11 : vector<1x32xf32> to vector<8x32xf32>
    %87 = arith.addf %85, %86 : vector<8x32xf32>
    %88 = math.tanh %87 : vector<8x32xf32>
    %89 = vector.broadcast %12 : vector<1x32xf32> to vector<8x32xf32>
    %90 = arith.mulf %88, %89 : vector<8x32xf32>
    %cst_22 = arith.constant dense<0.000000e+00> : vector<8xf32>
    %91 = vector.multi_reduction <add>, %90, %cst_22 [1] : vector<8x32xf32> to vector<8xf32>
    %92 = vector.shape_cast %91 : vector<8xf32> to vector<8x1xf32>
    %93 = vector.broadcast %13 : vector<1x1xf32> to vector<8x1xf32>
    %94 = arith.addf %92, %93 : vector<8x1xf32>
    %95 = vector.extract_strided_slice %7 {offsets = [16, 0], sizes = [8, 96], strides = [1, 1]} : vector<64x96xf32> to vector<8x96xf32>
    %cst_23 = arith.constant dense<0.000000e+00> : vector<8x96xf32>
    %96 = tpu.matmul %84, %8, %cst_23 {dimension_numbers = #tpu.dot_dimension_numbers<[1], [0], [0], [1], [0, 0, 1, 1], [], []>} : vector<8x32xf32>, vector<32x96xf32>, vector<8x96xf32> -> vector<8x96xf32>
    %97 = vector.broadcast %9 : vector<1x96xf32> to vector<8x96xf32>
    %98 = arith.addf %96, %97 : vector<8x96xf32>
    %99 = vector.extract_strided_slice %95 {offsets = [0, 0], sizes = [8, 32], strides = [1, 1]} : vector<8x96xf32> to vector<8x32xf32>
    %100 = vector.extract_strided_slice %98 {offsets = [0, 0], sizes = [8, 32], strides = [1, 1]} : vector<8x96xf32> to vector<8x32xf32>
    %101 = arith.addf %99, %100 : vector<8x32xf32>
    %102 = arith.negf %101 : vector<8x32xf32>
    %103 = math.exp %102 : vector<8x32xf32>
    %cst_24 = arith.constant 1.000000e+00 : f32
    %104 = vector.broadcast %cst_24 : f32 to vector<8x32xf32>
    %105 = arith.addf %104, %103 : vector<8x32xf32>
    %106 = arith.divf %104, %105 : vector<8x32xf32>
    %107 = vector.extract_strided_slice %95 {offsets = [0, 32], sizes = [8, 32], strides = [1, 1]} : vector<8x96xf32> to vector<8x32xf32>
    %108 = vector.extract_strided_slice %98 {offsets = [0, 32], sizes = [8, 32], strides = [1, 1]} : vector<8x96xf32> to vector<8x32xf32>
    %109 = arith.addf %107, %108 : vector<8x32xf32>
    %110 = arith.negf %109 : vector<8x32xf32>
    %111 = math.exp %110 : vector<8x32xf32>
    %cst_25 = arith.constant 1.000000e+00 : f32
    %112 = vector.broadcast %cst_25 : f32 to vector<8x32xf32>
    %113 = arith.addf %112, %111 : vector<8x32xf32>
    %114 = arith.divf %112, %113 : vector<8x32xf32>
    %115 = vector.extract_strided_slice %95 {offsets = [0, 64], sizes = [8, 32], strides = [1, 1]} : vector<8x96xf32> to vector<8x32xf32>
    %116 = vector.extract_strided_slice %98 {offsets = [0, 64], sizes = [8, 32], strides = [1, 1]} : vector<8x96xf32> to vector<8x32xf32>
    %117 = arith.mulf %106, %116 : vector<8x32xf32>
    %118 = arith.addf %115, %117 : vector<8x32xf32>
    %119 = math.tanh %118 : vector<8x32xf32>
    %cst_26 = arith.constant 1.000000e+00 : f32
    %120 = vector.broadcast %cst_26 : f32 to vector<8x32xf32>
    %121 = arith.subf %120, %114 : vector<8x32xf32>
    %122 = arith.mulf %121, %119 : vector<8x32xf32>
    %123 = arith.mulf %114, %84 : vector<8x32xf32>
    %124 = arith.addf %122, %123 : vector<8x32xf32>
    %cst_27 = arith.constant dense<0.000000e+00> : vector<8x32xf32>
    %125 = tpu.matmul %124, %10, %cst_27 {dimension_numbers = #tpu.dot_dimension_numbers<[1], [0], [0], [1], [0, 0, 1, 1], [], []>} : vector<8x32xf32>, vector<32x32xf32>, vector<8x32xf32> -> vector<8x32xf32>
    %126 = vector.broadcast %11 : vector<1x32xf32> to vector<8x32xf32>
    %127 = arith.addf %125, %126 : vector<8x32xf32>
    %128 = math.tanh %127 : vector<8x32xf32>
    %129 = vector.broadcast %12 : vector<1x32xf32> to vector<8x32xf32>
    %130 = arith.mulf %128, %129 : vector<8x32xf32>
    %cst_28 = arith.constant dense<0.000000e+00> : vector<8xf32>
    %131 = vector.multi_reduction <add>, %130, %cst_28 [1] : vector<8x32xf32> to vector<8xf32>
    %132 = vector.shape_cast %131 : vector<8xf32> to vector<8x1xf32>
    %133 = vector.broadcast %13 : vector<1x1xf32> to vector<8x1xf32>
    %134 = arith.addf %132, %133 : vector<8x1xf32>
    %135 = vector.extract_strided_slice %7 {offsets = [24, 0], sizes = [8, 96], strides = [1, 1]} : vector<64x96xf32> to vector<8x96xf32>
    %cst_29 = arith.constant dense<0.000000e+00> : vector<8x96xf32>
    %136 = tpu.matmul %124, %8, %cst_29 {dimension_numbers = #tpu.dot_dimension_numbers<[1], [0], [0], [1], [0, 0, 1, 1], [], []>} : vector<8x32xf32>, vector<32x96xf32>, vector<8x96xf32> -> vector<8x96xf32>
    %137 = vector.broadcast %9 : vector<1x96xf32> to vector<8x96xf32>
    %138 = arith.addf %136, %137 : vector<8x96xf32>
    %139 = vector.extract_strided_slice %135 {offsets = [0, 0], sizes = [8, 32], strides = [1, 1]} : vector<8x96xf32> to vector<8x32xf32>
    %140 = vector.extract_strided_slice %138 {offsets = [0, 0], sizes = [8, 32], strides = [1, 1]} : vector<8x96xf32> to vector<8x32xf32>
    %141 = arith.addf %139, %140 : vector<8x32xf32>
    %142 = arith.negf %141 : vector<8x32xf32>
    %143 = math.exp %142 : vector<8x32xf32>
    %cst_30 = arith.constant 1.000000e+00 : f32
    %144 = vector.broadcast %cst_30 : f32 to vector<8x32xf32>
    %145 = arith.addf %144, %143 : vector<8x32xf32>
    %146 = arith.divf %144, %145 : vector<8x32xf32>
    %147 = vector.extract_strided_slice %135 {offsets = [0, 32], sizes = [8, 32], strides = [1, 1]} : vector<8x96xf32> to vector<8x32xf32>
    %148 = vector.extract_strided_slice %138 {offsets = [0, 32], sizes = [8, 32], strides = [1, 1]} : vector<8x96xf32> to vector<8x32xf32>
    %149 = arith.addf %147, %148 : vector<8x32xf32>
    %150 = arith.negf %149 : vector<8x32xf32>
    %151 = math.exp %150 : vector<8x32xf32>
    %cst_31 = arith.constant 1.000000e+00 : f32
    %152 = vector.broadcast %cst_31 : f32 to vector<8x32xf32>
    %153 = arith.addf %152, %151 : vector<8x32xf32>
    %154 = arith.divf %152, %153 : vector<8x32xf32>
    %155 = vector.extract_strided_slice %135 {offsets = [0, 64], sizes = [8, 32], strides = [1, 1]} : vector<8x96xf32> to vector<8x32xf32>
    %156 = vector.extract_strided_slice %138 {offsets = [0, 64], sizes = [8, 32], strides = [1, 1]} : vector<8x96xf32> to vector<8x32xf32>
    %157 = arith.mulf %146, %156 : vector<8x32xf32>
    %158 = arith.addf %155, %157 : vector<8x32xf32>
    %159 = math.tanh %158 : vector<8x32xf32>
    %cst_32 = arith.constant 1.000000e+00 : f32
    %160 = vector.broadcast %cst_32 : f32 to vector<8x32xf32>
    %161 = arith.subf %160, %154 : vector<8x32xf32>
    %162 = arith.mulf %161, %159 : vector<8x32xf32>
    %163 = arith.mulf %154, %124 : vector<8x32xf32>
    %164 = arith.addf %162, %163 : vector<8x32xf32>
    %cst_33 = arith.constant dense<0.000000e+00> : vector<8x32xf32>
    %165 = tpu.matmul %164, %10, %cst_33 {dimension_numbers = #tpu.dot_dimension_numbers<[1], [0], [0], [1], [0, 0, 1, 1], [], []>} : vector<8x32xf32>, vector<32x32xf32>, vector<8x32xf32> -> vector<8x32xf32>
    %166 = vector.broadcast %11 : vector<1x32xf32> to vector<8x32xf32>
    %167 = arith.addf %165, %166 : vector<8x32xf32>
    %168 = math.tanh %167 : vector<8x32xf32>
    %169 = vector.broadcast %12 : vector<1x32xf32> to vector<8x32xf32>
    %170 = arith.mulf %168, %169 : vector<8x32xf32>
    %cst_34 = arith.constant dense<0.000000e+00> : vector<8xf32>
    %171 = vector.multi_reduction <add>, %170, %cst_34 [1] : vector<8x32xf32> to vector<8xf32>
    %172 = vector.shape_cast %171 : vector<8xf32> to vector<8x1xf32>
    %173 = vector.broadcast %13 : vector<1x1xf32> to vector<8x1xf32>
    %174 = arith.addf %172, %173 : vector<8x1xf32>
    %175 = vector.extract_strided_slice %7 {offsets = [32, 0], sizes = [8, 96], strides = [1, 1]} : vector<64x96xf32> to vector<8x96xf32>
    %cst_35 = arith.constant dense<0.000000e+00> : vector<8x96xf32>
    %176 = tpu.matmul %164, %8, %cst_35 {dimension_numbers = #tpu.dot_dimension_numbers<[1], [0], [0], [1], [0, 0, 1, 1], [], []>} : vector<8x32xf32>, vector<32x96xf32>, vector<8x96xf32> -> vector<8x96xf32>
    %177 = vector.broadcast %9 : vector<1x96xf32> to vector<8x96xf32>
    %178 = arith.addf %176, %177 : vector<8x96xf32>
    %179 = vector.extract_strided_slice %175 {offsets = [0, 0], sizes = [8, 32], strides = [1, 1]} : vector<8x96xf32> to vector<8x32xf32>
    %180 = vector.extract_strided_slice %178 {offsets = [0, 0], sizes = [8, 32], strides = [1, 1]} : vector<8x96xf32> to vector<8x32xf32>
    %181 = arith.addf %179, %180 : vector<8x32xf32>
    %182 = arith.negf %181 : vector<8x32xf32>
    %183 = math.exp %182 : vector<8x32xf32>
    %cst_36 = arith.constant 1.000000e+00 : f32
    %184 = vector.broadcast %cst_36 : f32 to vector<8x32xf32>
    %185 = arith.addf %184, %183 : vector<8x32xf32>
    %186 = arith.divf %184, %185 : vector<8x32xf32>
    %187 = vector.extract_strided_slice %175 {offsets = [0, 32], sizes = [8, 32], strides = [1, 1]} : vector<8x96xf32> to vector<8x32xf32>
    %188 = vector.extract_strided_slice %178 {offsets = [0, 32], sizes = [8, 32], strides = [1, 1]} : vector<8x96xf32> to vector<8x32xf32>
    %189 = arith.addf %187, %188 : vector<8x32xf32>
    %190 = arith.negf %189 : vector<8x32xf32>
    %191 = math.exp %190 : vector<8x32xf32>
    %cst_37 = arith.constant 1.000000e+00 : f32
    %192 = vector.broadcast %cst_37 : f32 to vector<8x32xf32>
    %193 = arith.addf %192, %191 : vector<8x32xf32>
    %194 = arith.divf %192, %193 : vector<8x32xf32>
    %195 = vector.extract_strided_slice %175 {offsets = [0, 64], sizes = [8, 32], strides = [1, 1]} : vector<8x96xf32> to vector<8x32xf32>
    %196 = vector.extract_strided_slice %178 {offsets = [0, 64], sizes = [8, 32], strides = [1, 1]} : vector<8x96xf32> to vector<8x32xf32>
    %197 = arith.mulf %186, %196 : vector<8x32xf32>
    %198 = arith.addf %195, %197 : vector<8x32xf32>
    %199 = math.tanh %198 : vector<8x32xf32>
    %cst_38 = arith.constant 1.000000e+00 : f32
    %200 = vector.broadcast %cst_38 : f32 to vector<8x32xf32>
    %201 = arith.subf %200, %194 : vector<8x32xf32>
    %202 = arith.mulf %201, %199 : vector<8x32xf32>
    %203 = arith.mulf %194, %164 : vector<8x32xf32>
    %204 = arith.addf %202, %203 : vector<8x32xf32>
    %cst_39 = arith.constant dense<0.000000e+00> : vector<8x32xf32>
    %205 = tpu.matmul %204, %10, %cst_39 {dimension_numbers = #tpu.dot_dimension_numbers<[1], [0], [0], [1], [0, 0, 1, 1], [], []>} : vector<8x32xf32>, vector<32x32xf32>, vector<8x32xf32> -> vector<8x32xf32>
    %206 = vector.broadcast %11 : vector<1x32xf32> to vector<8x32xf32>
    %207 = arith.addf %205, %206 : vector<8x32xf32>
    %208 = math.tanh %207 : vector<8x32xf32>
    %209 = vector.broadcast %12 : vector<1x32xf32> to vector<8x32xf32>
    %210 = arith.mulf %208, %209 : vector<8x32xf32>
    %cst_40 = arith.constant dense<0.000000e+00> : vector<8xf32>
    %211 = vector.multi_reduction <add>, %210, %cst_40 [1] : vector<8x32xf32> to vector<8xf32>
    %212 = vector.shape_cast %211 : vector<8xf32> to vector<8x1xf32>
    %213 = vector.broadcast %13 : vector<1x1xf32> to vector<8x1xf32>
    %214 = arith.addf %212, %213 : vector<8x1xf32>
    %215 = vector.extract_strided_slice %7 {offsets = [40, 0], sizes = [8, 96], strides = [1, 1]} : vector<64x96xf32> to vector<8x96xf32>
    %cst_41 = arith.constant dense<0.000000e+00> : vector<8x96xf32>
    %216 = tpu.matmul %204, %8, %cst_41 {dimension_numbers = #tpu.dot_dimension_numbers<[1], [0], [0], [1], [0, 0, 1, 1], [], []>} : vector<8x32xf32>, vector<32x96xf32>, vector<8x96xf32> -> vector<8x96xf32>
    %217 = vector.broadcast %9 : vector<1x96xf32> to vector<8x96xf32>
    %218 = arith.addf %216, %217 : vector<8x96xf32>
    %219 = vector.extract_strided_slice %215 {offsets = [0, 0], sizes = [8, 32], strides = [1, 1]} : vector<8x96xf32> to vector<8x32xf32>
    %220 = vector.extract_strided_slice %218 {offsets = [0, 0], sizes = [8, 32], strides = [1, 1]} : vector<8x96xf32> to vector<8x32xf32>
    %221 = arith.addf %219, %220 : vector<8x32xf32>
    %222 = arith.negf %221 : vector<8x32xf32>
    %223 = math.exp %222 : vector<8x32xf32>
    %cst_42 = arith.constant 1.000000e+00 : f32
    %224 = vector.broadcast %cst_42 : f32 to vector<8x32xf32>
    %225 = arith.addf %224, %223 : vector<8x32xf32>
    %226 = arith.divf %224, %225 : vector<8x32xf32>
    %227 = vector.extract_strided_slice %215 {offsets = [0, 32], sizes = [8, 32], strides = [1, 1]} : vector<8x96xf32> to vector<8x32xf32>
    %228 = vector.extract_strided_slice %218 {offsets = [0, 32], sizes = [8, 32], strides = [1, 1]} : vector<8x96xf32> to vector<8x32xf32>
    %229 = arith.addf %227, %228 : vector<8x32xf32>
    %230 = arith.negf %229 : vector<8x32xf32>
    %231 = math.exp %230 : vector<8x32xf32>
    %cst_43 = arith.constant 1.000000e+00 : f32
    %232 = vector.broadcast %cst_43 : f32 to vector<8x32xf32>
    %233 = arith.addf %232, %231 : vector<8x32xf32>
    %234 = arith.divf %232, %233 : vector<8x32xf32>
    %235 = vector.extract_strided_slice %215 {offsets = [0, 64], sizes = [8, 32], strides = [1, 1]} : vector<8x96xf32> to vector<8x32xf32>
    %236 = vector.extract_strided_slice %218 {offsets = [0, 64], sizes = [8, 32], strides = [1, 1]} : vector<8x96xf32> to vector<8x32xf32>
    %237 = arith.mulf %226, %236 : vector<8x32xf32>
    %238 = arith.addf %235, %237 : vector<8x32xf32>
    %239 = math.tanh %238 : vector<8x32xf32>
    %cst_44 = arith.constant 1.000000e+00 : f32
    %240 = vector.broadcast %cst_44 : f32 to vector<8x32xf32>
    %241 = arith.subf %240, %234 : vector<8x32xf32>
    %242 = arith.mulf %241, %239 : vector<8x32xf32>
    %243 = arith.mulf %234, %204 : vector<8x32xf32>
    %244 = arith.addf %242, %243 : vector<8x32xf32>
    %cst_45 = arith.constant dense<0.000000e+00> : vector<8x32xf32>
    %245 = tpu.matmul %244, %10, %cst_45 {dimension_numbers = #tpu.dot_dimension_numbers<[1], [0], [0], [1], [0, 0, 1, 1], [], []>} : vector<8x32xf32>, vector<32x32xf32>, vector<8x32xf32> -> vector<8x32xf32>
    %246 = vector.broadcast %11 : vector<1x32xf32> to vector<8x32xf32>
    %247 = arith.addf %245, %246 : vector<8x32xf32>
    %248 = math.tanh %247 : vector<8x32xf32>
    %249 = vector.broadcast %12 : vector<1x32xf32> to vector<8x32xf32>
    %250 = arith.mulf %248, %249 : vector<8x32xf32>
    %cst_46 = arith.constant dense<0.000000e+00> : vector<8xf32>
    %251 = vector.multi_reduction <add>, %250, %cst_46 [1] : vector<8x32xf32> to vector<8xf32>
    %252 = vector.shape_cast %251 : vector<8xf32> to vector<8x1xf32>
    %253 = vector.broadcast %13 : vector<1x1xf32> to vector<8x1xf32>
    %254 = arith.addf %252, %253 : vector<8x1xf32>
    %255 = vector.extract_strided_slice %7 {offsets = [48, 0], sizes = [8, 96], strides = [1, 1]} : vector<64x96xf32> to vector<8x96xf32>
    %cst_47 = arith.constant dense<0.000000e+00> : vector<8x96xf32>
    %256 = tpu.matmul %244, %8, %cst_47 {dimension_numbers = #tpu.dot_dimension_numbers<[1], [0], [0], [1], [0, 0, 1, 1], [], []>} : vector<8x32xf32>, vector<32x96xf32>, vector<8x96xf32> -> vector<8x96xf32>
    %257 = vector.broadcast %9 : vector<1x96xf32> to vector<8x96xf32>
    %258 = arith.addf %256, %257 : vector<8x96xf32>
    %259 = vector.extract_strided_slice %255 {offsets = [0, 0], sizes = [8, 32], strides = [1, 1]} : vector<8x96xf32> to vector<8x32xf32>
    %260 = vector.extract_strided_slice %258 {offsets = [0, 0], sizes = [8, 32], strides = [1, 1]} : vector<8x96xf32> to vector<8x32xf32>
    %261 = arith.addf %259, %260 : vector<8x32xf32>
    %262 = arith.negf %261 : vector<8x32xf32>
    %263 = math.exp %262 : vector<8x32xf32>
    %cst_48 = arith.constant 1.000000e+00 : f32
    %264 = vector.broadcast %cst_48 : f32 to vector<8x32xf32>
    %265 = arith.addf %264, %263 : vector<8x32xf32>
    %266 = arith.divf %264, %265 : vector<8x32xf32>
    %267 = vector.extract_strided_slice %255 {offsets = [0, 32], sizes = [8, 32], strides = [1, 1]} : vector<8x96xf32> to vector<8x32xf32>
    %268 = vector.extract_strided_slice %258 {offsets = [0, 32], sizes = [8, 32], strides = [1, 1]} : vector<8x96xf32> to vector<8x32xf32>
    %269 = arith.addf %267, %268 : vector<8x32xf32>
    %270 = arith.negf %269 : vector<8x32xf32>
    %271 = math.exp %270 : vector<8x32xf32>
    %cst_49 = arith.constant 1.000000e+00 : f32
    %272 = vector.broadcast %cst_49 : f32 to vector<8x32xf32>
    %273 = arith.addf %272, %271 : vector<8x32xf32>
    %274 = arith.divf %272, %273 : vector<8x32xf32>
    %275 = vector.extract_strided_slice %255 {offsets = [0, 64], sizes = [8, 32], strides = [1, 1]} : vector<8x96xf32> to vector<8x32xf32>
    %276 = vector.extract_strided_slice %258 {offsets = [0, 64], sizes = [8, 32], strides = [1, 1]} : vector<8x96xf32> to vector<8x32xf32>
    %277 = arith.mulf %266, %276 : vector<8x32xf32>
    %278 = arith.addf %275, %277 : vector<8x32xf32>
    %279 = math.tanh %278 : vector<8x32xf32>
    %cst_50 = arith.constant 1.000000e+00 : f32
    %280 = vector.broadcast %cst_50 : f32 to vector<8x32xf32>
    %281 = arith.subf %280, %274 : vector<8x32xf32>
    %282 = arith.mulf %281, %279 : vector<8x32xf32>
    %283 = arith.mulf %274, %244 : vector<8x32xf32>
    %284 = arith.addf %282, %283 : vector<8x32xf32>
    %cst_51 = arith.constant dense<0.000000e+00> : vector<8x32xf32>
    %285 = tpu.matmul %284, %10, %cst_51 {dimension_numbers = #tpu.dot_dimension_numbers<[1], [0], [0], [1], [0, 0, 1, 1], [], []>} : vector<8x32xf32>, vector<32x32xf32>, vector<8x32xf32> -> vector<8x32xf32>
    %286 = vector.broadcast %11 : vector<1x32xf32> to vector<8x32xf32>
    %287 = arith.addf %285, %286 : vector<8x32xf32>
    %288 = math.tanh %287 : vector<8x32xf32>
    %289 = vector.broadcast %12 : vector<1x32xf32> to vector<8x32xf32>
    %290 = arith.mulf %288, %289 : vector<8x32xf32>
    %cst_52 = arith.constant dense<0.000000e+00> : vector<8xf32>
    %291 = vector.multi_reduction <add>, %290, %cst_52 [1] : vector<8x32xf32> to vector<8xf32>
    %292 = vector.shape_cast %291 : vector<8xf32> to vector<8x1xf32>
    %293 = vector.broadcast %13 : vector<1x1xf32> to vector<8x1xf32>
    %294 = arith.addf %292, %293 : vector<8x1xf32>
    %295 = vector.extract_strided_slice %7 {offsets = [56, 0], sizes = [8, 96], strides = [1, 1]} : vector<64x96xf32> to vector<8x96xf32>
    %cst_53 = arith.constant dense<0.000000e+00> : vector<8x96xf32>
    %296 = tpu.matmul %284, %8, %cst_53 {dimension_numbers = #tpu.dot_dimension_numbers<[1], [0], [0], [1], [0, 0, 1, 1], [], []>} : vector<8x32xf32>, vector<32x96xf32>, vector<8x96xf32> -> vector<8x96xf32>
    %297 = vector.broadcast %9 : vector<1x96xf32> to vector<8x96xf32>
    %298 = arith.addf %296, %297 : vector<8x96xf32>
    %299 = vector.extract_strided_slice %295 {offsets = [0, 0], sizes = [8, 32], strides = [1, 1]} : vector<8x96xf32> to vector<8x32xf32>
    %300 = vector.extract_strided_slice %298 {offsets = [0, 0], sizes = [8, 32], strides = [1, 1]} : vector<8x96xf32> to vector<8x32xf32>
    %301 = arith.addf %299, %300 : vector<8x32xf32>
    %302 = arith.negf %301 : vector<8x32xf32>
    %303 = math.exp %302 : vector<8x32xf32>
    %cst_54 = arith.constant 1.000000e+00 : f32
    %304 = vector.broadcast %cst_54 : f32 to vector<8x32xf32>
    %305 = arith.addf %304, %303 : vector<8x32xf32>
    %306 = arith.divf %304, %305 : vector<8x32xf32>
    %307 = vector.extract_strided_slice %295 {offsets = [0, 32], sizes = [8, 32], strides = [1, 1]} : vector<8x96xf32> to vector<8x32xf32>
    %308 = vector.extract_strided_slice %298 {offsets = [0, 32], sizes = [8, 32], strides = [1, 1]} : vector<8x96xf32> to vector<8x32xf32>
    %309 = arith.addf %307, %308 : vector<8x32xf32>
    %310 = arith.negf %309 : vector<8x32xf32>
    %311 = math.exp %310 : vector<8x32xf32>
    %cst_55 = arith.constant 1.000000e+00 : f32
    %312 = vector.broadcast %cst_55 : f32 to vector<8x32xf32>
    %313 = arith.addf %312, %311 : vector<8x32xf32>
    %314 = arith.divf %312, %313 : vector<8x32xf32>
    %315 = vector.extract_strided_slice %295 {offsets = [0, 64], sizes = [8, 32], strides = [1, 1]} : vector<8x96xf32> to vector<8x32xf32>
    %316 = vector.extract_strided_slice %298 {offsets = [0, 64], sizes = [8, 32], strides = [1, 1]} : vector<8x96xf32> to vector<8x32xf32>
    %317 = arith.mulf %306, %316 : vector<8x32xf32>
    %318 = arith.addf %315, %317 : vector<8x32xf32>
    %319 = math.tanh %318 : vector<8x32xf32>
    %cst_56 = arith.constant 1.000000e+00 : f32
    %320 = vector.broadcast %cst_56 : f32 to vector<8x32xf32>
    %321 = arith.subf %320, %314 : vector<8x32xf32>
    %322 = arith.mulf %321, %319 : vector<8x32xf32>
    %323 = arith.mulf %314, %284 : vector<8x32xf32>
    %324 = arith.addf %322, %323 : vector<8x32xf32>
    %cst_57 = arith.constant dense<0.000000e+00> : vector<8x32xf32>
    %325 = tpu.matmul %324, %10, %cst_57 {dimension_numbers = #tpu.dot_dimension_numbers<[1], [0], [0], [1], [0, 0, 1, 1], [], []>} : vector<8x32xf32>, vector<32x32xf32>, vector<8x32xf32> -> vector<8x32xf32>
    %326 = vector.broadcast %11 : vector<1x32xf32> to vector<8x32xf32>
    %327 = arith.addf %325, %326 : vector<8x32xf32>
    %328 = math.tanh %327 : vector<8x32xf32>
    %329 = vector.broadcast %12 : vector<1x32xf32> to vector<8x32xf32>
    %330 = arith.mulf %328, %329 : vector<8x32xf32>
    %cst_58 = arith.constant dense<0.000000e+00> : vector<8xf32>
    %331 = vector.multi_reduction <add>, %330, %cst_58 [1] : vector<8x32xf32> to vector<8xf32>
    %332 = vector.shape_cast %331 : vector<8xf32> to vector<8x1xf32>
    %333 = vector.broadcast %13 : vector<1x1xf32> to vector<8x1xf32>
    %334 = arith.addf %332, %333 : vector<8x1xf32>
    %335 = arith.maximumf %54, %94 : vector<8x1xf32>
    %336 = arith.maximumf %335, %134 : vector<8x1xf32>
    %337 = arith.maximumf %336, %174 : vector<8x1xf32>
    %338 = arith.maximumf %337, %214 : vector<8x1xf32>
    %339 = arith.maximumf %338, %254 : vector<8x1xf32>
    %340 = arith.maximumf %339, %294 : vector<8x1xf32>
    %341 = arith.maximumf %340, %334 : vector<8x1xf32>
    %342 = arith.subf %54, %341 : vector<8x1xf32>
    %343 = math.exp %342 : vector<8x1xf32>
    %344 = arith.subf %94, %341 : vector<8x1xf32>
    %345 = math.exp %344 : vector<8x1xf32>
    %346 = arith.subf %134, %341 : vector<8x1xf32>
    %347 = math.exp %346 : vector<8x1xf32>
    %348 = arith.subf %174, %341 : vector<8x1xf32>
    %349 = math.exp %348 : vector<8x1xf32>
    %350 = arith.subf %214, %341 : vector<8x1xf32>
    %351 = math.exp %350 : vector<8x1xf32>
    %352 = arith.subf %254, %341 : vector<8x1xf32>
    %353 = math.exp %352 : vector<8x1xf32>
    %354 = arith.subf %294, %341 : vector<8x1xf32>
    %355 = math.exp %354 : vector<8x1xf32>
    %356 = arith.subf %334, %341 : vector<8x1xf32>
    %357 = math.exp %356 : vector<8x1xf32>
    %358 = arith.addf %343, %345 : vector<8x1xf32>
    %359 = arith.addf %358, %347 : vector<8x1xf32>
    %360 = arith.addf %359, %349 : vector<8x1xf32>
    %361 = arith.addf %360, %351 : vector<8x1xf32>
    %362 = arith.addf %361, %353 : vector<8x1xf32>
    %363 = arith.addf %362, %355 : vector<8x1xf32>
    %364 = arith.addf %363, %357 : vector<8x1xf32>
    %365 = tpu.reciprocal %364 {approx = true} : vector<8x1xf32> -> vector<8x1xf32>
    %366 = arith.mulf %343, %365 : vector<8x1xf32>
    %367 = vector.broadcast %366 : vector<8x1xf32> to vector<8x32xf32>
    %368 = arith.mulf %367, %44 : vector<8x32xf32>
    %369 = arith.mulf %345, %365 : vector<8x1xf32>
    %370 = vector.broadcast %369 : vector<8x1xf32> to vector<8x32xf32>
    %371 = arith.mulf %370, %84 : vector<8x32xf32>
    %372 = arith.addf %368, %371 : vector<8x32xf32>
    %373 = arith.mulf %347, %365 : vector<8x1xf32>
    %374 = vector.broadcast %373 : vector<8x1xf32> to vector<8x32xf32>
    %375 = arith.mulf %374, %124 : vector<8x32xf32>
    %376 = arith.addf %372, %375 : vector<8x32xf32>
    %377 = arith.mulf %349, %365 : vector<8x1xf32>
    %378 = vector.broadcast %377 : vector<8x1xf32> to vector<8x32xf32>
    %379 = arith.mulf %378, %164 : vector<8x32xf32>
    %380 = arith.addf %376, %379 : vector<8x32xf32>
    %381 = arith.mulf %351, %365 : vector<8x1xf32>
    %382 = vector.broadcast %381 : vector<8x1xf32> to vector<8x32xf32>
    %383 = arith.mulf %382, %204 : vector<8x32xf32>
    %384 = arith.addf %380, %383 : vector<8x32xf32>
    %385 = arith.mulf %353, %365 : vector<8x1xf32>
    %386 = vector.broadcast %385 : vector<8x1xf32> to vector<8x32xf32>
    %387 = arith.mulf %386, %244 : vector<8x32xf32>
    %388 = arith.addf %384, %387 : vector<8x32xf32>
    %389 = arith.mulf %355, %365 : vector<8x1xf32>
    %390 = vector.broadcast %389 : vector<8x1xf32> to vector<8x32xf32>
    %391 = arith.mulf %390, %284 : vector<8x32xf32>
    %392 = arith.addf %388, %391 : vector<8x32xf32>
    %393 = arith.mulf %357, %365 : vector<8x1xf32>
    %394 = vector.broadcast %393 : vector<8x1xf32> to vector<8x32xf32>
    %395 = arith.mulf %394, %324 : vector<8x32xf32>
    %396 = arith.addf %392, %395 : vector<8x32xf32>
    %c0_59 = arith.constant 0 : index
    %c0_60 = arith.constant 0 : index
    %397 = vector.load %arg1[%c0_59, %c0_60] : memref<8x16xf32, #tpu.memory_space<vmem>>, vector<8x16xf32>
    %c56 = arith.constant 56 : index
    %c0_61 = arith.constant 0 : index
    %398 = vector.load %arg4[%c56, %c0_61] : memref<120x32xf32, #tpu.memory_space<vmem>>, vector<16x32xf32>
    %cst_62 = arith.constant dense<0.000000e+00> : vector<8x32xf32>
    %399 = tpu.matmul %397, %398, %cst_62 {dimension_numbers = #tpu.dot_dimension_numbers<[1], [0], [0], [1], [0, 0, 1, 1], [], []>} : vector<8x16xf32>, vector<16x32xf32>, vector<8x32xf32> -> vector<8x32xf32>
    %c0_63 = arith.constant 0 : index
    %c0_64 = arith.constant 0 : index
    %400 = vector.load %arg2[%c0_63, %c0_64] : memref<8x8xf32, #tpu.memory_space<vmem>>, vector<8x8xf32>
    %c72 = arith.constant 72 : index
    %c0_65 = arith.constant 0 : index
    %401 = vector.load %arg4[%c72, %c0_65] : memref<120x32xf32, #tpu.memory_space<vmem>>, vector<8x32xf32>
    %cst_66 = arith.constant dense<0.000000e+00> : vector<8x32xf32>
    %402 = tpu.matmul %400, %401, %cst_66 {dimension_numbers = #tpu.dot_dimension_numbers<[1], [0], [0], [1], [0, 0, 1, 1], [], []>} : vector<8x8xf32>, vector<8x32xf32>, vector<8x32xf32> -> vector<8x32xf32>
    %403 = arith.addf %399, %402 : vector<8x32xf32>
    %c80 = arith.constant 80 : index
    %c0_67 = arith.constant 0 : index
    %404 = vector.load %arg4[%c80, %c0_67] : memref<120x32xf32, #tpu.memory_space<vmem>>, vector<32x32xf32>
    %cst_68 = arith.constant dense<0.000000e+00> : vector<8x32xf32>
    %405 = tpu.matmul %396, %404, %cst_68 {dimension_numbers = #tpu.dot_dimension_numbers<[1], [0], [0], [1], [0, 0, 1, 1], [], []>} : vector<8x32xf32>, vector<32x32xf32>, vector<8x32xf32> -> vector<8x32xf32>
    %406 = arith.addf %403, %405 : vector<8x32xf32>
    %c112 = arith.constant 112 : index
    %c0_69 = arith.constant 0 : index
    %407 = vector.load %arg4[%c112, %c0_69] : memref<120x32xf32, #tpu.memory_space<vmem>>, vector<1x32xf32>
    %408 = vector.broadcast %407 : vector<1x32xf32> to vector<8x32xf32>
    %409 = arith.addf %406, %408 : vector<8x32xf32>
    %410 = vector.shape_cast %409 : vector<8x32xf32> to vector<8x4x8xf32>
    %cst_70 = arith.constant dense<0xFF800000> : vector<8x4xf32>
    %411 = vector.multi_reduction <maximumf>, %410, %cst_70 [2] : vector<8x4x8xf32> to vector<8x4xf32>
    %412 = vector.shape_cast %411 : vector<8x4xf32> to vector<8x4x1xf32>
    %413 = vector.broadcast %412 : vector<8x4x1xf32> to vector<8x4x8xf32>
    %414 = arith.subf %410, %413 : vector<8x4x8xf32>
    %415 = math.exp %414 : vector<8x4x8xf32>
    %cst_71 = arith.constant dense<0.000000e+00> : vector<8x4xf32>
    %416 = vector.multi_reduction <add>, %415, %cst_71 [2] : vector<8x4x8xf32> to vector<8x4xf32>
    %417 = vector.shape_cast %416 : vector<8x4xf32> to vector<8x4x1xf32>
    %418 = math.log %417 : vector<8x4x1xf32>
    %419 = arith.addf %412, %418 : vector<8x4x1xf32>
    %420 = vector.broadcast %419 : vector<8x4x1xf32> to vector<8x4x8xf32>
    %421 = arith.subf %410, %420 : vector<8x4x8xf32>
    %cst_72 = arith.constant dense<0xFF800000> : vector<8x4xf32>
    %422 = vector.multi_reduction <maximumf>, %421, %cst_72 [2] : vector<8x4x8xf32> to vector<8x4xf32>
    %423 = vector.shape_cast %422 : vector<8x4xf32> to vector<8x4x1xf32>
    %424 = tpu.iota {dimensions = array<i32: 2>} : vector<8x4x8xi32>
    %425 = vector.broadcast %423 : vector<8x4x1xf32> to vector<8x4x8xf32>
    %426 = arith.cmpf oge, %421, %425 : vector<8x4x8xf32>
    %c8_i32 = arith.constant 8 : i32
    %427 = vector.broadcast %c8_i32 : i32 to vector<8x4x8xi32>
    %428 = arith.select %426, %424, %427 : vector<8x4x8xi1>, vector<8x4x8xi32>
    %cst_73 = arith.constant dense<2147483647> : vector<8x4xi32>
    %429 = vector.multi_reduction <minsi>, %428, %cst_73 [2] : vector<8x4x8xi32> to vector<8x4xi32>
    %430 = vector.shape_cast %429 : vector<8x4xi32> to vector<8x4x1xi32>
    %431 = vector.broadcast %430 : vector<8x4x1xi32> to vector<8x4x8xi32>
    %432 = arith.cmpi eq, %424, %431 : vector<8x4x8xi32>
    %433 = arith.extui %432 : vector<8x4x8xi1> to vector<8x4x8xi32>
    %434 = arith.sitofp %433 : vector<8x4x8xi32> to vector<8x4x8xf32>
    %cst_74 = arith.constant dense<0.000000e+00> : vector<8x1xf32>
    %435 = vector.multi_reduction <add>, %423, %cst_74 [1] : vector<8x4x1xf32> to vector<8x1xf32>
    %cst_75 = arith.constant 0.000000e+00 : f32
    %436 = vector.broadcast %cst_75 : f32 to vector<8x128xf32>
    %c0_76 = arith.constant 0 : index
    %c0_77 = arith.constant 0 : index
    %437 = vector.load %arg5[%c0_76, %c0_77] : memref<8x128xf32, #tpu.memory_space<vmem>>, vector<8x128xf32>
    tpu.vector_store %arg5[%c0_76, %c0_77], %436 {strides = array<i32>} : memref<8x128xf32, #tpu.memory_space<vmem>>, vector<8x128xf32>,
    %438 = vector.shape_cast %434 : vector<8x4x8xf32> to vector<8x32xf32>
    %c0_78 = arith.constant 0 : index
    %c0_79 = arith.constant 0 : index
    %439 = vector.load %arg5[%c0_78, %c0_79] : memref<8x128xf32, #tpu.memory_space<vmem>>, vector<8x32xf32>
    tpu.vector_store %arg5[%c0_78, %c0_79], %438 {strides = array<i32>} : memref<8x128xf32, #tpu.memory_space<vmem>>, vector<8x32xf32>,
    %440 = vector.shape_cast %421 : vector<8x4x8xf32> to vector<8x32xf32>
    %c0_80 = arith.constant 0 : index
    %c32_81 = arith.constant 32 : index
    %441 = vector.load %arg5[%c0_80, %c32_81] : memref<8x128xf32, #tpu.memory_space<vmem>>, vector<8x32xf32>
    tpu.vector_store %arg5[%c0_80, %c32_81], %440 {strides = array<i32>} : memref<8x128xf32, #tpu.memory_space<vmem>>, vector<8x32xf32>,
    %c0_82 = arith.constant 0 : index
    %c64_83 = arith.constant 64 : index
    %442 = vector.load %arg5[%c0_82, %c64_83] : memref<8x128xf32, #tpu.memory_space<vmem>>, vector<8x1xf32>
    tpu.vector_store %arg5[%c0_82, %c64_83], %435 {strides = array<i32>} : memref<8x128xf32, #tpu.memory_space<vmem>>, vector<8x1xf32>,
    return
  }
}

</mosaic_0001>

<bundles_post_ra>
// kernel: actor_forward.1
= control target key start
LH: loop header
LB: loop body
LE: loop exit
PB: predicated region body
PF: predicated region fallthrough
CT: control target
= control target key end

     0   :  { %v1866_v0 = vmov 0   ;;  %v1867_v11 = vmov 0.0   ;;  %v28_v15 = vlaneseq  ;;  %vm86_vm0 = vcmask 523264   ;;  %s1868_s21 = smov 64   ;;  %s1870_s17 = smov 120   ;;  %s2621_s0 = inlined_call_operand.vmem [shape: s32[64,1], index: 0, kind: input, shape index: {}]   ;;  %s2622_s3 = inlined_call_operand.vmem [shape: f32[104,96], index: 3, kind: input, shape index: {}]   ;;  %s2623_s4 = inlined_call_operand.vmem [shape: f32[120,32], index: 4, kind: input, shape index: {}]   ;;  %s2624_s2 = inlined_call_operand.vmem [shape: f32[8,8], index: 2, kind: input, shape index: {}]   ;;  %s2625_s1 = inlined_call_operand.vmem [shape: f32[8,16], index: 1, kind: input, shape index: {}]   ;;  %s2626_s5 = inlined_call_operand.vmem [shape: f32[8,128], index: 5, kind: output, shape index: {}]  }
   0x1   :  { %1744 = vset.pattern.permute.xlu0 %v1866_v0  ;;  %v20_v1 = vld [vmem:[%s2621_s0] sm:$0xff]  ;;  %v1915_v2 = vld [vmem:[%s2622_s3 + $0x58] sm:$0xff]  ;;  %v1920_v3 = vld [vmem:[%s2622_s3 + $0x50] sm:$0xff]  ;;  %1745 = vset.pattern.permute.xlu2 %v1866_v0  ;;  %vm165_vm6 = vcmask 261120   ;;  %s1871_s18 = smov 104   ;;  %1493 = vst [vmem:[%s2626_s5] sm:$0xff] %v1867_v11  ;;  %s1876_s20 = smov 16  }
   0x2   :  { %31 = vperm.xlu0 %1744, %v20_v1   ;;  %181 = vmatpush.msra.mxu1 %v1915_v2  ;;  %v85_v4 = vld [vmem:[%s2622_s3 + $0x38] sm:$0xff]  ;;  %v1929_v5 = vld [vmem:[%s2622_s3 + $0x48] sm:$0xff]  ;;  %v84_v6 = vld [vmem:[%s2622_s3 + $0x30] sm:$0xff]  ;;  %v1965_v16 = vand.u32 127, %v28_v15  ;;  %s1877_s22 = smov 24   ;;  %s1878_s24 = smov 32  }
   0x3   :  { %119 = vmatpush.msra.mxu0 %v85_v4  ;;  %274 = vmatpush.msra.mxu3 %v1915_v2  ;;  %v83_v7 = vld [vmem:[%s2622_s3 + $0x28] sm:$0xff]  ;;  %v1942_v8 = vld [vmem:[%s2622_s3 + $0x40] sm:$0xff]  ;;  %v81_v10 = vld [vmem:[%s2622_s3 + $0x18] sm:$0xff] }
   0x4   :  { %182 = vmatpush.msra.mxu1 %v1920_v3  ;;  %1723 = vmatpush.msra.mxu2 %v85_v4  ;;  %v82_v9 = vld [vmem:[%s2622_s3 + $0x20] sm:$0xff]  ;;  %v80_v12 = vld [vmem:[%s2622_s3 + $0x10] sm:$0xff]  ;;  %v79_v13 = vld [vmem:[%s2622_s3 + $0x8] sm:$0xff] }
   0x5   :  { %120 = vmatpush.msra.mxu0 %v84_v6  ;;  %275 = vmatpush.msra.mxu3 %v1920_v3  ;;  %v78_v14 = vld [vmem:[%s2622_s3] sm:$0xff]  ;;  %v21_v47 = vld [vmem:[%s2621_s0 + $0x8] sm:$0xff]  ;;  %v27_v53 = vld [vmem:[%s2621_s0 + $0x38] sm:$0xff] }
   0x6   :  { %183 = vmatpush.msra.mxu1 %v1929_v5  ;;  %1724 = vmatpush.msra.mxu2 %v84_v6  ;;  %v1973_v19 = vld [vmem:[%s2622_s3 + $0x60] ss:$0 sm:$0xff]  ;;  %s1869_s3 = smov 96   ;;  %v2001_v60 = vld [vmem:[%s2623_s4 + $0x18] sm:$0xff]  ;;  %v2006_v61 = vld [vmem:[%s2623_s4 + $0x10] sm:$0xff] }
   0x7   :  { %121 = vmatpush.msra.mxu0 %v83_v7  ;;  %276 = vmatpush.msra.mxu3 %v1929_v5  ;;  %v2013_v63 = vld [vmem:[%s2623_s4 + $0x8] sm:$0xff] }
   0x8   :  { %184 = vmatpush.msra.mxu1 %v1942_v8  ;;  %1725 = vmatpush.msra.mxu2 %v83_v7 }
   0x9   :  { %185 = vmatmul.f32.vlgmr.msra.gmra.mxu1 %v1867_v11  ;;  %122 = vmatpush.msra.mxu0 %v82_v9 }
   0xa   :  { %277 = vmatpush.msra.mxu3 %v1942_v8  ;;  %1726 = vmatpush.msra.mxu2 %v82_v9 }
   0xb   :  { %123 = vmatpush.msra.mxu0 %v81_v10  ;;  %1746 = vset.pattern.permute.xlu1 %v1866_v0  ;;  %v2021_v0 = vld [vmem:[%s2623_s4] sm:$0xff] }
   0xc   :  { %1727 = vmatpush.msra.mxu2 %v81_v10  ;;  %338 = vmatpush.msrb.mxu1 %v2001_v60 }
   0xd   :  { %124 = vmatpush.msra.mxu0 %v80_v12  ;;  %428 = vmatpush.msrb.mxu3 %v2001_v60 }
   0xe   :  { %1728 = vmatpush.msra.mxu2 %v80_v12  ;;  %339 = vmatpush.msrb.mxu1 %v2006_v61 }
   0xf   :  { %125 = vmatpush.msra.mxu0 %v79_v13  ;;  %429 = vmatpush.msrb.mxu3 %v2006_v61 }
  0x10   :  { %1729 = vmatpush.msra.mxu2 %v79_v13  ;;  %340 = vmatpush.msrb.mxu1 %v2013_v63 }
  0x11   :  { %126 = vmatpush.msra.mxu0 %v78_v14  ;;  %430 = vmatpush.msrb.mxu3 %v2013_v63 }
  0x12   :  { %1730 = vmatpush.msra.mxu2 %v78_v14  ;;  %341 = vmatpush.msrb.mxu1 %v2021_v0 }
  0x13   :  { %431 = vmatpush.msrb.mxu3 %v2021_v0 }
  0x14   :  { %246 = vmatpush.msrb.mxu2 %v2001_v60  ;;  %454 = vmatpush.msra.mxu1 %v1915_v2 }
  0x16   :  { %247 = vmatpush.msrb.mxu2 %v2006_v61  ;;  %455 = vmatpush.msra.mxu1 %v1920_v3 }
  0x18   :  { %248 = vmatpush.msrb.mxu2 %v2013_v63  ;;  %456 = vmatpush.msra.mxu1 %v1929_v5 }
  0x1a   :  { %249 = vmatpush.msrb.mxu2 %v2021_v0  ;;  %457 = vmatpush.msra.mxu1 %v1942_v8 }
  0x74   :  { %v32_v17 = vpop.permute.xlu0 %31 }
  0x75   :  { %vm54_vm1 = vcmp.eq.s32.totalorder %v1965_v16, %v32_v17 }
  0x76   :  { %v1673_v18 = vsel %vm54_vm1, 1.0, %v1867_v11 }
  0x77   :  { %1681 = vmatmul.msk.f32.vlgmr.msra.gmra.mxu0 %vm86_vm0, %v1673_v18 }
  0x86   :  { %v186_v20 = vpop.f32.mrf.mxu1 }
  0x87   :  { %v187_v21 = vadd.f32 %v1973_v19, %v186_v20 }
  0x89   :  { %210 = vrot.lane.b32.xlu0 %v187_v21, %s1868_s21 }
  0xf4   :  { %v128_v22 = vpop.f32.mrf.mxu0 }
  0xf5   :  { %v189_v23 = vadd.f32 %v187_v21, %v128_v22 }
  0xf7   :  { %v1689_v24 = vmul.f32 -1.442695, %v189_v23  ;;  %v22_v23 = vld [vmem:[%s2621_s0 + $0x10] sm:$0xff] }
  0xf9   :  { %1752 = vpow2.f32 %v1689_v24 }
  0xfb   :  { %v211_v35 = vpop.permute.xlu0 %210 }
  0xff   :  { %v1753_v25 = vpop.eup %1752 }
 0x100   :  { %v193_v26 = vadd.f32 1.0, %v1753_v25 }
 0x102   :  { %1754 = vrcp.f32 %v193_v26  ;;  %v205_v30 = vand.u32 2147483648, %v193_v26  ;;  %v203_v32 = vand.u32 2147483647, %v193_v26  ;;  %vm199_vm3 = vweird.f32 %v193_v26 }
 0x104   :  { %v206_v34 = vor.u32 1.1754944e-38, %v205_v30  ;;  %vm204_vm5 = vcmp.eq.f32.partialorder %v203_v32, 8.507059e+37 }
 0x108   :  { %v1755_v27 = vpop.eup %1754 }
 0x109   :  { %v195_v28 = vmul.f32 %v1755_v27, %v193_v26  ;;  %vm200_vm2 = vweird.f32 %v1755_v27 }
 0x10a   :  { %vm201_vm4 = vmor %vm199_vm3, %vm200_vm2 }
 0x10b   :  { %v196_v29 = vsub.f32 1.0, %v195_v28 }
 0x10d   :  { %v197_v31 = vmul.f32 %v1755_v27, %v196_v29 }
 0x10f   :  { %v198_v33 = vadd.f32 %v1755_v27, %v197_v31 }
 0x111   :  { %v202_v36 = vsel %vm201_vm4, %v1755_v27, %v198_v33 }
 0x112   :  { %v207_v37 = vsel %vm204_vm5, %v206_v34, %v202_v36 }
 0x113   :  { %v213_v38 = vmul.f32 %v211_v35, %v207_v37  ;;  %v220_v42 = vsub.f32 1.0, %v207_v37  ;;  %v226_v44 = vmul.f32 0.0, %v207_v37 }
 0x115   :  { %215 = vrot.lane.b32.xlu1 %v213_v38, %s1868_s21 }
 0x187   :  { %v216_v39 = vpop.permute.xlu1 %215 }
 0x188   :  { %v218_v40 = vadd.f32 %v216_v39, %v128_v22 }
 0x18a   :  { %1756 = vtanh.f32 %v218_v40 }
 0x190   :  { %v1757_v41 = vpop.eup %1756 }
 0x191   :  { %222 = vrot.lane.b32.xlu1 %v1757_v41, %s1869_s3 }
 0x203   :  { %v223_v43 = vpop.permute.xlu1 %222 }
 0x204   :  { %v225_v45 = vmul.f32 %v223_v43, %v220_v42 }
 0x206   :  { %v1979_v46 = vadd.f32 %v226_v44, %v225_v45 }
 0x208   :  { %230 = vrot.lane.b32.xlu2 %v1979_v46, %s1869_s3 }
 0x210   :  { %34 = vperm.xlu2 %1745, %v21_v47  }
 0x262   :  { %v1986_v48 = vpop.permute.xlu2 %230 }
 0x263   :  { %1691 = vmatmul.msk.f32.vlgmr.msra.gmra.mxu3 %vm165_vm6, %v1986_v48 }
 0x264   :  { %544 = vmatpush.msra.mxu3 %v1915_v2 }
 0x266   :  { %545 = vmatpush.msra.mxu3 %v1920_v3 }
 0x268   :  { %546 = vmatpush.msra.mxu3 %v1929_v5 }
 0x26a   :  { %v35_v49 = vpop.permute.xlu2 %34  ;;  %547 = vmatpush.msra.mxu3 %v1942_v8 }
 0x26b   :  { %vm55_vm7 = vcmp.eq.s32.totalorder %v1965_v16, %v35_v49 }
 0x26c   :  { %v1674_v50 = vsel %vm55_vm7, 1.0, %v1867_v11 }
 0x26d   :  { %1682 = vmatmul.msk.f32.gmra.mxu0 %vm86_vm0, %v1674_v50 }
 0x2e6   :  { %v279_v51 = vpop.f32.mrf.mxu3 }
 0x2e7   :  { %v280_v52 = vadd.f32 %v1973_v19, %v279_v51 }
 0x2e9   :  { %303 = vrot.lane.b32.xlu0 %v280_v52, %s1868_s21 }
 0x2ea   :  { %v131_v54 = vpop.f32.mrf.mxu0 }
 0x2eb   :  { %v282_v55 = vadd.f32 %v280_v52, %v131_v54 }
 0x2ed   :  { %v1692_v56 = vmul.f32 -1.442695, %v282_v55 }
 0x2ef   :  { %1758 = vpow2.f32 %v1692_v56 }
 0x2f1   :  { %52 = vperm.xlu0 %1744, %v27_v53  }
 0x2f5   :  { %v1759_v57 = vpop.eup %1758 }
 0x2f6   :  { %v286_v58 = vadd.f32 1.0, %v1759_v57  ;;  %v23_v57 = vld [vmem:[%s2621_s0 + $0x18] sm:$0xff] }
 0x2f8   :  { %1760 = vrcp.f32 %v286_v58  ;;  %v298_v7 = vand.u32 2147483648, %v286_v58  ;;  %vm292_vm9 = vweird.f32 %v286_v58  ;;  %v296_v9 = vand.u32 2147483647, %v286_v58 }
 0x2fa   :  { %v299_v12 = vor.u32 1.1754944e-38, %v298_v7  ;;  %vm297_vm11 = vcmp.eq.f32.partialorder %v296_v9, 8.507059e+37 }
 0x2fe   :  { %v1761_v59 = vpop.eup %1760 }
 0x2ff   :  { %v288_v62 = vmul.f32 %v1761_v59, %v286_v58  ;;  %vm293_vm8 = vweird.f32 %v1761_v59 }
 0x300   :  { %vm294_vm10 = vmor %vm292_vm9, %vm293_vm8 }
 0x301   :  { %v289_v1 = vsub.f32 1.0, %v288_v62 }
 0x303   :  { %v290_v4 = vmul.f32 %v1761_v59, %v289_v1 }
 0x305   :  { %v291_v6 = vadd.f32 %v1761_v59, %v290_v4 }
 0x307   :  { %v295_v10 = vsel %vm294_vm10, %v1761_v59, %v291_v6 }
 0x308   :  { %v300_v14 = vsel %vm297_vm11, %v299_v12, %v295_v10 }
 0x309   :  { %v313_v24 = vsub.f32 1.0, %v300_v14  ;;  %v319_v26 = vmul.f32 %v300_v14, %v1979_v46 }
 0x35b   :  { %v304_v13 = vpop.permute.xlu0 %303 }
 0x35c   :  { %v306_v15 = vmul.f32 %v304_v13, %v300_v14 }
 0x35e   :  { %308 = vrot.lane.b32.xlu1 %v306_v15, %s1868_s21 }
 0x363   :  { %v53_v17 = vpop.permute.xlu0 %52 }
 0x364   :  { %vm61_vm12 = vcmp.eq.s32.totalorder %v1965_v16, %v53_v17 }
 0x365   :  { %v1680_v18 = vsel %vm61_vm12, 1.0, %v1867_v11 }
 0x366   :  { %1688 = vmatmul.msk.f32.vlgmr.msra.gmra.mxu2 %vm86_vm0, %v1680_v18 }
 0x367   :  { %364 = vmatpush.msra.mxu2 %v1915_v2 }
 0x369   :  { %365 = vmatpush.msra.mxu2 %v1920_v3 }
 0x36b   :  { %366 = vmatpush.msra.mxu2 %v1929_v5 }
 0x36d   :  { %367 = vmatpush.msra.mxu2 %v1942_v8 }
 0x36e   :  { %1690 = vmatmul.msk.f32.vlgmr.msrb.gmra.mxu2 %vm165_vm6, %v1986_v48 }
 0x36f   :  { %518 = vmatpush.msrb.mxu2 %v2001_v60 }
 0x371   :  { %519 = vmatpush.msrb.mxu2 %v2006_v61 }
 0x373   :  { %520 = vmatpush.msrb.mxu2 %v2013_v63 }
 0x375   :  { %521 = vmatpush.msrb.mxu2 %v2021_v0 }
 0x3d0   :  { %v309_v20 = vpop.permute.xlu1 %308 }
 0x3d1   :  { %v311_v21 = vadd.f32 %v309_v20, %v131_v54 }
 0x3d3   :  { %1762 = vtanh.f32 %v311_v21 }
 0x3d9   :  { %v1763_v22 = vpop.eup %1762 }
 0x3da   :  { %315 = vrot.lane.b32.xlu2 %v1763_v22, %s1869_s3 }
 0x3e2   :  { %37 = vperm.xlu2 %1745, %v22_v23  }
 0x3e9   :  { %v2074_v32 = vpop.f32.mrf.mxu2 }
 0x3f1   :  { %v2076_v33 = vpop.f32.mrf.mxu2 }
 0x434   :  { %v316_v25 = vpop.permute.xlu2 %315 }
 0x435   :  { %v318_v27 = vmul.f32 %v316_v25, %v313_v24 }
 0x437   :  { %v2057_v28 = vadd.f32 %v319_v26, %v318_v27 }
 0x439   :  { %322 = vrot.lane.b32.xlu1 %v2057_v28, %s1869_s3 }
 0x43c   :  { %v38_v29 = vpop.permute.xlu2 %37 }
 0x43d   :  { %vm56_vm13 = vcmp.eq.s32.totalorder %v1965_v16, %v38_v29 }
 0x43e   :  { %v1675_v30 = vsel %vm56_vm13, 1.0, %v1867_v11 }
 0x43f   :  { %1683 = vmatmul.msk.f32.gmra.mxu0 %vm86_vm0, %v1675_v30 }
 0x4ab   :  { %v323_v31 = vpop.permute.xlu1 %322 }
 0x4ac   :  { %1693 = vmatmul.msk.f32.vlgmr.msrb.gmra.mxu1 %vm165_vm6, %v323_v31  ;;  %1694 = vmatmul.msk.f32.vlgmr.msra.gmra.mxu2 %vm165_vm6, %v323_v31 }
 0x4ad   :  { %634 = vmatpush.msra.mxu2 %v1915_v2  ;;  %608 = vmatpush.msrb.mxu1 %v2001_v60 }
 0x4af   :  { %635 = vmatpush.msra.mxu2 %v1920_v3  ;;  %609 = vmatpush.msrb.mxu1 %v2006_v61 }
 0x4b1   :  { %636 = vmatpush.msra.mxu2 %v1929_v5  ;;  %610 = vmatpush.msrb.mxu1 %v2013_v63 }
 0x4b3   :  { %637 = vmatpush.msra.mxu2 %v1942_v8  ;;  %611 = vmatpush.msrb.mxu1 %v2021_v0 }
 0x4bc   :  { %v134_v36 = vpop.f32.mrf.mxu0 }
 0x529   :  { %v2103_v10 = vpop.f32.mrf.mxu1 }
 0x52f   :  { %v369_v34 = vpop.f32.mrf.mxu2 }
 0x530   :  { %v370_v35 = vadd.f32 %v1973_v19, %v369_v34 }
 0x532   :  { %393 = vrot.lane.b32.xlu0 %v370_v35, %s1868_s21  ;;  %v372_v37 = vadd.f32 %v370_v35, %v134_v36 }
 0x534   :  { %v1695_v38 = vmul.f32 -1.442695, %v372_v37 }
 0x536   :  { %1764 = vpow2.f32 %v1695_v38 }
 0x53c   :  { %v1765_v39 = vpop.eup %1764 }
 0x53d   :  { %v376_v40 = vadd.f32 1.0, %v1765_v39 }
 0x53f   :  { %1766 = vrcp.f32 %v376_v40  ;;  %v388_v47 = vand.u32 2147483648, %v376_v40  ;;  %vm382_vm15 = vweird.f32 %v376_v40  ;;  %v386_v48 = vand.u32 2147483647, %v376_v40 }
 0x541   :  { %v389_v50 = vor.u32 1.1754944e-38, %v388_v47  ;;  %vm387_vm2 = vcmp.eq.f32.partialorder %v386_v48, 8.507059e+37 }
 0x545   :  { %v1767_v41 = vpop.eup %1766 }
 0x546   :  { %v378_v42 = vmul.f32 %v1767_v41, %v376_v40  ;;  %vm383_vm14 = vweird.f32 %v1767_v41 }
 0x547   :  { %vm384_vm1 = vmor %vm382_vm15, %vm383_vm14 }
 0x548   :  { %v379_v43 = vsub.f32 1.0, %v378_v42 }
 0x54a   :  { %v380_v44 = vmul.f32 %v1767_v41, %v379_v43 }
 0x54c   :  { %v381_v45 = vadd.f32 %v1767_v41, %v380_v44 }
 0x54e   :  { %v385_v49 = vsel %vm384_vm1, %v1767_v41, %v381_v45 }
 0x54f   :  { %v390_v52 = vsel %vm387_vm2, %v389_v50, %v385_v49 }
 0x550   :  { %v403_v58 = vsub.f32 1.0, %v390_v52  ;;  %v409_v62 = vmul.f32 %v390_v52, %v2057_v28 }
 0x5a4   :  { %v394_v51 = vpop.permute.xlu0 %393 }
 0x5a5   :  { %v396_v53 = vmul.f32 %v394_v51, %v390_v52 }
 0x5a7   :  { %398 = vrot.lane.b32.xlu1 %v396_v53, %s1868_s21 }
 0x5af   :  { %40 = vperm.xlu1 %1746, %v23_v57  }
 0x619   :  { %v399_v54 = vpop.permute.xlu1 %398 }
 0x61a   :  { %v401_v55 = vadd.f32 %v399_v54, %v134_v36  ;;  %v24_v36 = vld [vmem:[%s2621_s0 + $0x20] sm:$0xff] }
 0x61c   :  { %1768 = vtanh.f32 %v401_v55 }
 0x621   :  { %v41_v6 = vpop.permute.xlu1 %40 }
 0x622   :  { %v1769_v56 = vpop.eup %1768  ;;  %vm57_vm3 = vcmp.eq.s32.totalorder %v1965_v16, %v41_v6 }
 0x623   :  { %405 = vrot.lane.b32.xlu2 %v1769_v56, %s1869_s3  ;;  %v1676_v7 = vsel %vm57_vm3, 1.0, %v1867_v11 }
 0x624   :  { %1684 = vmatmul.msk.f32.gmra.mxu0 %vm86_vm0, %v1676_v7 }
 0x67d   :  { %v406_v59 = vpop.permute.xlu2 %405 }
 0x67e   :  { %v408_v1 = vmul.f32 %v406_v59, %v403_v58 }
 0x680   :  { %v2086_v4 = vadd.f32 %v409_v62, %v408_v1 }
 0x682   :  { %412 = vrot.lane.b32.xlu0 %v2086_v4, %s1869_s3 }
 0x6a1   :  { %v137_v14 = vpop.f32.mrf.mxu0 }
 0x6f4   :  { %v413_v9 = vpop.permute.xlu0 %412 }
 0x6f5   :  { %1696 = vmatmul.msk.f32.vlgmr.msrb.gmra.mxu3 %vm165_vm6, %v413_v9  ;;  %1697 = vmatmul.msk.f32.vlgmr.msra.gmra.mxu1 %vm165_vm6, %v413_v9 }
 0x6f6   :  { %724 = vmatpush.msra.mxu1 %v1915_v2  ;;  %698 = vmatpush.msrb.mxu3 %v2001_v60 }
 0x6f8   :  { %725 = vmatpush.msra.mxu1 %v1920_v3  ;;  %699 = vmatpush.msrb.mxu3 %v2006_v61 }
 0x6fa   :  { %726 = vmatpush.msra.mxu1 %v1929_v5  ;;  %700 = vmatpush.msrb.mxu3 %v2013_v63 }
 0x6fc   :  { %727 = vmatpush.msra.mxu1 %v1942_v8  ;;  %701 = vmatpush.msrb.mxu3 %v2021_v0 }
 0x772   :  { %v459_v12 = vpop.f32.mrf.mxu1 }
 0x773   :  { %v460_v13 = vadd.f32 %v1973_v19, %v459_v12  ;;  %v25_v12 = vld [vmem:[%s2621_s0 + $0x28] sm:$0xff] }
 0x775   :  { %483 = vrot.lane.b32.xlu2 %v460_v13, %s1868_s21  ;;  %v462_v15 = vadd.f32 %v460_v13, %v137_v14 }
 0x777   :  { %v1698_v17 = vmul.f32 -1.442695, %v462_v15 }
 0x778   :  { %v2130_v49 = vpop.f32.mrf.mxu3 }
 0x779   :  { %1770 = vpow2.f32 %v1698_v17 }
 0x77f   :  { %v1771_v18 = vpop.eup %1770 }
 0x780   :  { %v466_v20 = vadd.f32 1.0, %v1771_v18 }
 0x782   :  { %1772 = vrcp.f32 %v466_v20  ;;  %v478_v26 = vand.u32 2147483648, %v466_v20  ;;  %vm472_vm5 = vweird.f32 %v466_v20  ;;  %v476_v27 = vand.u32 2147483647, %v466_v20 }
 0x784   :  { %v479_v30 = vor.u32 1.1754944e-38, %v478_v26  ;;  %vm477_vm8 = vcmp.eq.f32.partialorder %v476_v27, 8.507059e+37 }
 0x788   :  { %v1773_v21 = vpop.eup %1772 }
 0x789   :  { %v468_v22 = vmul.f32 %v1773_v21, %v466_v20  ;;  %vm473_vm4 = vweird.f32 %v1773_v21 }
 0x78a   :  { %vm474_vm7 = vmor %vm472_vm5, %vm473_vm4 }
 0x78b   :  { %v469_v23 = vsub.f32 1.0, %v468_v22 }
 0x78d   :  { %v470_v24 = vmul.f32 %v1773_v21, %v469_v23 }
 0x78f   :  { %v471_v25 = vadd.f32 %v1773_v21, %v470_v24 }
 0x791   :  { %v475_v29 = vsel %vm474_vm7, %v1773_v21, %v471_v25 }
 0x792   :  { %v480_v34 = vsel %vm477_vm8, %v479_v30, %v475_v29 }
 0x793   :  { %v493_v42 = vsub.f32 1.0, %v480_v34  ;;  %v499_v44 = vmul.f32 %v480_v34, %v2086_v4 }
 0x7cf   :  { %v484_v31 = vpop.permute.xlu2 %483 }
 0x7d0   :  { %v486_v35 = vmul.f32 %v484_v31, %v480_v34 }
 0x7d2   :  { %488 = vrot.lane.b32.xlu0 %v486_v35, %s1868_s21 }
 0x7da   :  { %43 = vperm.xlu0 %1744, %v24_v36  }
 0x844   :  { %v489_v37 = vpop.permute.xlu0 %488 }
 0x845   :  { %v491_v38 = vadd.f32 %v489_v37, %v137_v14 }
 0x847   :  { %1774 = vtanh.f32 %v491_v38 }
 0x84c   :  { %v44_v39 = vpop.permute.xlu0 %43 }
 0x84d   :  { %v1775_v40 = vpop.eup %1774  ;;  %vm58_vm9 = vcmp.eq.s32.totalorder %v1965_v16, %v44_v39 }
 0x84e   :  { %v1677_v41 = vsel %vm58_vm9, 1.0, %v1867_v11  ;;  %495 = vrot.lane.b32.xlu1 %v1775_v40, %s1869_s3 }
 0x84f   :  { %1685 = vmatmul.msk.f32.gmra.mxu0 %vm86_vm0, %v1677_v41 }
 0x8c0   :  { %v496_v43 = vpop.permute.xlu1 %495 }
 0x8c1   :  { %v498_v45 = vmul.f32 %v496_v43, %v493_v42 }
 0x8c3   :  { %v2116_v47 = vadd.f32 %v499_v44, %v498_v45  ;;  %v26_v45 = vld [vmem:[%s2621_s0 + $0x30] sm:$0xff]  ;;  %s1872_s0 = smov 112  }
 0x8c5   :  { %502 = vrot.lane.b32.xlu2 %v2116_v47, %s1869_s3 }
 0x91f   :  { %v503_v48 = vpop.permute.xlu2 %502 }
 0x920   :  { %1699 = vmatmul.msk.f32.vlgmr.msrb.gmra.mxu2 %vm165_vm6, %v503_v48  ;;  %1700 = vmatmul.msk.f32.vlgmr.msra.gmra.mxu3 %vm165_vm6, %v503_v48 }
 0x921   :  { %814 = vmatpush.msra.mxu3 %v1915_v2  ;;  %788 = vmatpush.msrb.mxu2 %v2001_v60  ;;  %v140_v2 = vpop.f32.mrf.mxu0 }
 0x923   :  { %815 = vmatpush.msra.mxu3 %v1920_v3  ;;  %789 = vmatpush.msrb.mxu2 %v2006_v61 }
 0x925   :  { %816 = vmatpush.msra.mxu3 %v1929_v5  ;;  %790 = vmatpush.msrb.mxu2 %v2013_v63 }
 0x927   :  { %817 = vmatpush.msra.mxu3 %v1942_v8  ;;  %791 = vmatpush.msrb.mxu2 %v2021_v0 }
 0x9a3   :  { %v549_v50 = vpop.f32.mrf.mxu3  ;;  %v2153_v26 = vpop.f32.mrf.mxu2 }
 0x9a4   :  { %v550_v51 = vadd.f32 %v1973_v19, %v549_v50 }
 0x9a6   :  { %573 = vrot.lane.b32.xlu1 %v550_v51, %s1868_s21  ;;  %v552_v52 = vadd.f32 %v550_v51, %v140_v2 }
 0x9a8   :  { %v1701_v3 = vmul.f32 -1.442695, %v552_v52 }
 0x9aa   :  { %1776 = vpow2.f32 %v1701_v3 }
 0x9b0   :  { %v1777_v53 = vpop.eup %1776 }
 0x9b1   :  { %v556_v54 = vadd.f32 1.0, %v1777_v53 }
 0x9b3   :  { %1778 = vrcp.f32 %v556_v54  ;;  %v568_v58 = vand.u32 2147483648, %v556_v54  ;;  %vm562_vm11 = vweird.f32 %v556_v54  ;;  %v566_v59 = vand.u32 2147483647, %v556_v54 }
 0x9b5   :  { %v569_v1 = vor.u32 1.1754944e-38, %v568_v58  ;;  %vm567_vm13 = vcmp.eq.f32.partialorder %v566_v59, 8.507059e+37 }
 0x9b9   :  { %v1779_v5 = vpop.eup %1778 }
 0x9ba   :  { %v558_v55 = vmul.f32 %v1779_v5, %v556_v54  ;;  %vm563_vm10 = vweird.f32 %v1779_v5 }
 0x9bb   :  { %vm564_vm12 = vmor %vm562_vm11, %vm563_vm10 }
 0x9bc   :  { %v559_v56 = vsub.f32 1.0, %v558_v55 }
 0x9be   :  { %v560_v8 = vmul.f32 %v1779_v5, %v559_v56 }
 0x9c0   :  { %v561_v57 = vadd.f32 %v1779_v5, %v560_v8 }
 0x9c2   :  { %v565_v62 = vsel %vm564_vm12, %v1779_v5, %v561_v57 }
 0x9c3   :  { %v570_v7 = vsel %vm567_vm13, %v569_v1, %v565_v62  ;;  %vm999_vm13 = vcmask 64512  }
 0x9c4   :  { %v583_v20 = vsub.f32 1.0, %v570_v7  ;;  %v589_v22 = vmul.f32 %v570_v7, %v2116_v47 }
 0xa18   :  { %v574_v6 = vpop.permute.xlu1 %573 }
 0xa19   :  { %v576_v9 = vmul.f32 %v574_v6, %v570_v7 }
 0xa1b   :  { %578 = vrot.lane.b32.xlu2 %v576_v9, %s1868_s21 }
 0xa23   :  { %46 = vperm.xlu2 %1745, %v25_v12  }
 0xa75   :  { %v579_v13 = vpop.permute.xlu2 %578 }
 0xa76   :  { %v581_v14 = vadd.f32 %v579_v13, %v140_v2 }
 0xa78   :  { %1780 = vtanh.f32 %v581_v14 }
 0xa7d   :  { %v47_v15 = vpop.permute.xlu2 %46 }
 0xa7e   :  { %v1781_v17 = vpop.eup %1780  ;;  %vm59_vm14 = vcmp.eq.s32.totalorder %v1965_v16, %v47_v15 }
 0xa7f   :  { %v1678_v18 = vsel %vm59_vm14, 1.0, %v1867_v11  ;;  %585 = vrot.lane.b32.xlu0 %v1781_v17, %s1869_s3  ;;  %vm1023_vm14 = vcmask 130048  }
 0xa80   :  { %1686 = vmatmul.msk.f32.gmra.mxu0 %vm86_vm0, %v1678_v18 }
 0xaf1   :  { %v586_v21 = vpop.permute.xlu0 %585 }
 0xaf2   :  { %v588_v23 = vmul.f32 %v586_v21, %v583_v20 }
 0xaf4   :  { %v2143_v24 = vadd.f32 %v589_v22, %v588_v23 }
 0xaf6   :  { %592 = vrot.lane.b32.xlu1 %v2143_v24, %s1869_s3 }
 0xafd   :  { %v143_v30 = vpop.f32.mrf.mxu0 }
 0xb68   :  { %v593_v25 = vpop.permute.xlu1 %592 }
 0xb69   :  { %1702 = vmatmul.msk.f32.vlgmr.msrb.gmra.mxu1 %vm165_vm6, %v593_v25  ;;  %1703 = vmatmul.msk.f32.vlgmr.msra.gmra.mxu2 %vm165_vm6, %v593_v25 }
 0xb6a   :  { %878 = vmatpush.msrb.mxu1 %v2001_v60 }
 0xb6c   :  { %879 = vmatpush.msrb.mxu1 %v2006_v61 }
 0xb6e   :  { %880 = vmatpush.msrb.mxu1 %v2013_v63 }
 0xb70   :  { %881 = vmatpush.msrb.mxu1 %v2021_v0 }
 0xbe6   :  { %v2172_v8 = vpop.f32.mrf.mxu1 }
 0xbec   :  { %v639_v27 = vpop.f32.mrf.mxu2 }
 0xbed   :  { %v640_v29 = vadd.f32 %v1973_v19, %v639_v27 }
 0xbef   :  { %663 = vrot.lane.b32.xlu0 %v640_v29, %s1868_s21  ;;  %v642_v31 = vadd.f32 %v640_v29, %v143_v30 }
 0xbf1   :  { %v1704_v34 = vmul.f32 -1.442695, %v642_v31 }
 0xbf3   :  { %1782 = vpow2.f32 %v1704_v34 }
 0xbf9   :  { %v1783_v35 = vpop.eup %1782 }
 0xbfa   :  { %v646_v36 = vadd.f32 1.0, %v1783_v35 }
 0xbfc   :  { %1784 = vrcp.f32 %v646_v36  ;;  %v658_v0 = vand.u32 2147483648, %v646_v36  ;;  %vm652_vm1 = vweird.f32 %v646_v36  ;;  %v656_v39 = vand.u32 2147483647, %v646_v36 }
 0xbfe   :  { %v659_v41 = vor.u32 1.1754944e-38, %v658_v0  ;;  %vm657_vm3 = vcmp.eq.f32.partialorder %v656_v39, 8.507059e+37 }
 0xc02   :  { %v1785_v60 = vpop.eup %1784 }
 0xc03   :  { %v648_v61 = vmul.f32 %v1785_v60, %v646_v36  ;;  %vm653_vm15 = vweird.f32 %v1785_v60 }
 0xc04   :  { %vm654_vm2 = vmor %vm652_vm1, %vm653_vm15  ;;  %vm1091_vm15 = vcmask 1047556   ;;  %vm1147_vm1 = vcmask 60416  }
 0xc05   :  { %v649_v37 = vsub.f32 1.0, %v648_v61 }
 0xc07   :  { %v650_v63 = vmul.f32 %v1785_v60, %v649_v37 }
 0xc09   :  { %v651_v38 = vadd.f32 %v1785_v60, %v650_v63 }
 0xc0b   :  { %v655_v40 = vsel %vm654_vm2, %v1785_v60, %v651_v38 }
 0xc0c   :  { %v660_v43 = vsel %vm657_vm3, %v659_v41, %v655_v40 }
 0xc0d   :  { %v673_v3 = vsub.f32 1.0, %v660_v43  ;;  %v679_v54 = vmul.f32 %v660_v43, %v2143_v24 }
 0xc61   :  { %v664_v42 = vpop.permute.xlu0 %663 }
 0xc62   :  { %v666_v44 = vmul.f32 %v664_v42, %v660_v43 }
 0xc64   :  { %668 = vrot.lane.b32.xlu1 %v666_v44, %s1868_s21 }
 0xc6c   :  { %49 = vperm.xlu1 %1746, %v26_v45  }
 0xcd6   :  { %v669_v48 = vpop.permute.xlu1 %668 }
 0xcd7   :  { %v671_v50 = vadd.f32 %v669_v48, %v143_v30 }
 0xcd9   :  { %1786 = vtanh.f32 %v671_v50 }
 0xcde   :  { %v50_v51 = vpop.permute.xlu1 %49 }
 0xcdf   :  { %v1787_v2 = vpop.eup %1786  ;;  %vm60_vm4 = vcmp.eq.s32.totalorder %v1965_v16, %v50_v51 }
 0xce0   :  { %v1679_v52 = vsel %vm60_vm4, 1.0, %v1867_v11  ;;  %675 = vrot.lane.b32.xlu2 %v1787_v2, %s1869_s3  ;;  %vm1436_vm4 = vcmask 1043456  }
 0xce1   :  { %1687 = vmatmul.msk.f32.gmra.mxu0 %vm86_vm0, %v1679_v52 }
 0xd3a   :  { %v676_v53 = vpop.permute.xlu2 %675 }
 0xd3b   :  { %v678_v5 = vmul.f32 %v676_v53, %v673_v3 }
 0xd3d   :  { %v2166_v55 = vadd.f32 %v679_v54, %v678_v5  ;;  %v1748_v54 = vld [vmem:[%s2623_s4 + $0x20] ss:$0 sm:$0xff] }
 0xd3e   :  { %v252_v5 = vadd.f32 %v1748_v54, %v2076_v33 }
 0xd3f   :  { %682 = vrot.lane.b32.xlu0 %v2166_v55, %s1869_s3 }
 0xd5e   :  { %v146_v59 = vpop.f32.mrf.mxu0 }
 0xdb1   :  { %v683_v56 = vpop.permute.xlu0 %682 }
 0xdb2   :  { %1705 = vmatmul.msk.f32.vlgmr.msrb.gmra.mxu3 %vm165_vm6, %v683_v56  ;;  %1706 = vmatmul.msk.f32.vlgmr.msra.gmra.mxu1 %vm165_vm6, %v683_v56  ;;  %v614_v56 = vadd.f32 %v1748_v54, %v2172_v8 }
 0xe2f   :  { %v729_v57 = vpop.f32.mrf.mxu1 }
 0xe30   :  { %v730_v58 = vadd.f32 %v1973_v19, %v729_v57  ;;  %v1749_v57 = vld [vmem:[%s2623_s4 + $0x28] ss:$0 sm:$0xff] }
 0xe32   :  { %753 = vrot.lane.b32.xlu2 %v730_v58, %s1868_s21  ;;  %v732_v62 = vadd.f32 %v730_v58, %v146_v59 }
 0xe34   :  { %v1707_v1 = vmul.f32 -1.442695, %v732_v62 }
 0xe35   :  { %v703_v37 = vpop.f32.mrf.mxu3 }
 0xe36   :  { %1788 = vpow2.f32 %v1707_v1 }
 0xe3c   :  { %v1789_v6 = vpop.eup %1788 }
 0xe3d   :  { %v736_v7 = vadd.f32 1.0, %v1789_v6 }
 0xe3f   :  { %1790 = vrcp.f32 %v736_v7  ;;  %v748_v17 = vand.u32 2147483648, %v736_v7  ;;  %vm742_vm5 = vweird.f32 %v736_v7  ;;  %v746_v18 = vand.u32 2147483647, %v736_v7 }
 0xe41   :  { %v749_v21 = vor.u32 1.1754944e-38, %v748_v17  ;;  %vm747_vm8 = vcmp.eq.f32.partialorder %v746_v18, 8.507059e+37  ;;  %v704_v17 = vadd.f32 %v1748_v54, %v703_v37 }
 0xe45   :  { %v1791_v9 = vpop.eup %1790 }
 0xe46   :  { %v738_v12 = vmul.f32 %v1791_v9, %v736_v7  ;;  %vm743_vm0 = vweird.f32 %v1791_v9 }
 0xe47   :  { %vm744_vm7 = vmor %vm742_vm5, %vm743_vm0 }
 0xe48   :  { %v739_v13 = vsub.f32 1.0, %v738_v12  ;;  %v344_v12 = vadd.f32 %v1748_v54, %v2103_v10 }
 0xe4a   :  { %v740_v14 = vmul.f32 %v1791_v9, %v739_v13  ;;  %v524_v13 = vadd.f32 %v1748_v54, %v2153_v26 }
 0xe4c   :  { %v741_v15 = vadd.f32 %v1791_v9, %v740_v14 }
 0xe4e   :  { %v745_v20 = vsel %vm744_vm7, %v1791_v9, %v741_v15 }
 0xe4f   :  { %v750_v23 = vsel %vm747_vm8, %v749_v21, %v745_v20 }
 0xe50   :  { %v763_v31 = vsub.f32 1.0, %v750_v23  ;;  %v769_v35 = vmul.f32 %v750_v23, %v2166_v55 }
 0xe8c   :  { %v754_v22 = vpop.permute.xlu2 %753 }
 0xe8d   :  { %v756_v25 = vmul.f32 %v754_v22, %v750_v23 }
 0xe8f   :  { %758 = vrot.lane.b32.xlu0 %v756_v25, %s1868_s21 }
 0xf01   :  { %v759_v27 = vpop.permute.xlu0 %758 }
 0xf02   :  { %v761_v29 = vadd.f32 %v759_v27, %v146_v59 }
 0xf04   :  { %1792 = vtanh.f32 %v761_v29 }
 0xf0a   :  { %v1793_v30 = vpop.eup %1792 }
 0xf0b   :  { %765 = vrot.lane.b32.xlu1 %v1793_v30, %s1869_s3 }
 0xf7d   :  { %v766_v34 = vpop.permute.xlu1 %765 }
 0xf7e   :  { %v768_v36 = vmul.f32 %v766_v34, %v763_v31  ;;  %v434_v31 = vadd.f32 %v1748_v54, %v2130_v49 }
 0xf80   :  { %v2179_v60 = vadd.f32 %v769_v35, %v768_v36 }
 0xf82   :  { %772 = vrot.lane.b32.xlu2 %v2179_v60, %s1869_s3 }
 0xfdc   :  { %v773_v61 = vpop.permute.xlu2 %772 }
 0xfdd   :  { %1708 = vmatmul.msk.f32.vlgmr.msrb.gmra.mxu2 %vm165_vm6, %v773_v61  ;;  %1709 = vmatmul.msk.f32.vlgmr.msra.gmra.mxu3 %vm165_vm6, %v773_v61 }
0x1060   :  { %v819_v63 = vpop.f32.mrf.mxu3  ;;  %v793_v34 = vpop.f32.mrf.mxu2 }
0x1061   :  { %v820_v38 = vadd.f32 %v1973_v19, %v819_v63  ;;  %v794_v35 = vadd.f32 %v1748_v54, %v793_v34 }
0x1063   :  { %843 = vrot.lane.b32.xlu0 %v820_v38, %s1868_s21  ;;  %v822_v0 = vadd.f32 %v820_v38, %v2074_v32 }
0x1065   :  { %v1710_v39 = vmul.f32 -1.442695, %v822_v0 }
0x1067   :  { %1794 = vpow2.f32 %v1710_v39 }
0x106d   :  { %v1795_v40 = vpop.eup %1794 }
0x106e   :  { %v826_v41 = vadd.f32 1.0, %v1795_v40 }
0x1070   :  { %1796 = vrcp.f32 %v826_v41  ;;  %v838_v50 = vand.u32 2147483648, %v826_v41  ;;  %vm832_vm10 = vweird.f32 %v826_v41  ;;  %v836_v51 = vand.u32 2147483647, %v826_v41 }
0x1071   :  { %1798 = vtanh.f32 %v252_v5 }
0x1072   :  { %v839_v2 = vor.u32 1.1754944e-38, %v838_v50  ;;  %vm837_vm12 = vcmp.eq.f32.partialorder %v836_v51, 8.507059e+37  ;;  %1800 = vtanh.f32 %v614_v56 }
0x1076   :  { %v1797_v42 = vpop.eup %1796 }
0x1077   :  { %v828_v43 = vmul.f32 %v1797_v42, %v826_v41  ;;  %vm833_vm9 = vweird.f32 %v1797_v42  ;;  %v1799_v58 = vpop.eup %1798 }
0x1078   :  { %vm834_vm11 = vmor %vm832_vm10, %vm833_vm9  ;;  %v256_v59 = vmul.f32 %v1799_v58, %v1749_v57  ;;  %v1801_v1 = vpop.eup %1800  ;;  %vm1652_vm9 = vcmask 1041409   ;;  %vm1654_vm10 = vcmask 1042434  }
0x1079   :  { %v829_v44 = vsub.f32 1.0, %v828_v43  ;;  %v617_v6 = vmul.f32 %v1801_v1, %v1749_v57 }
0x107a   :  { %v257_v62 = vsel %vm165_vm6, %v256_v59, 0.0 }
0x107b   :  { %v830_v45 = vmul.f32 %v1797_v42, %v829_v44  ;;  %v618_v7 = vsel %vm165_vm6, %v617_v6, 0.0 }
0x107d   :  { %v831_v48 = vadd.f32 %v1797_v42, %v830_v45  ;;  %v1750_v45 = vld [vmem:[%s2623_s4 + $0x30] ss:$0 sm:$0xff] }
0x107f   :  { %v835_v19 = vsel %vm834_vm11, %v1797_v42, %v831_v48 }
0x1080   :  { %v840_v3 = vsel %vm837_vm12, %v839_v2, %v835_v19 }
0x1081   :  { %v853_v25 = vsub.f32 1.0, %v840_v3  ;;  %v859_v27 = vmul.f32 %v840_v3, %v2179_v60 }
0x10d5   :  { %v844_v52 = vpop.permute.xlu0 %843 }
0x10d6   :  { %v846_v53 = vmul.f32 %v844_v52, %v840_v3 }
0x10d8   :  { %848 = vrot.lane.b32.xlu1 %v846_v53, %s1868_s21 }
0x1102   :  { %258 = vadd.xlane.f32.xlu1 %v257_v62 }
0x110a   :  { %619 = vadd.xlane.f32.xlu1 %v618_v7 }
0x114a   :  { %v849_v9 = vpop.permute.xlu1 %848 }
0x114b   :  { %v851_v33 = vadd.f32 %v849_v9, %v2074_v32 }
0x114d   :  { %1802 = vtanh.f32 %v851_v33 }
0x114e   :  { %1804 = vtanh.f32 %v344_v12 }
0x114f   :  { %1806 = vtanh.f32 %v524_v13 }
0x1150   :  { %1808 = vtanh.f32 %v704_v17 }
0x1151   :  { %1810 = vtanh.f32 %v434_v31 }
0x1152   :  { %1812 = vtanh.f32 %v794_v35 }
0x1153   :  { %v1803_v8 = vpop.eup %1802 }
0x1154   :  { %855 = vrot.lane.b32.xlu2 %v1803_v8, %s1869_s3  ;;  %v1805_v14 = vpop.eup %1804 }
0x1155   :  { %v347_v15 = vmul.f32 %v1805_v14, %v1749_v57  ;;  %v1807_v20 = vpop.eup %1806 }
0x1156   :  { %v527_v21 = vmul.f32 %v1807_v20, %v1749_v57  ;;  %v1809_v22 = vpop.eup %1808 }
0x1157   :  { %v348_v18 = vsel %vm165_vm6, %v347_v15, 0.0  ;;  %v707_v23 = vmul.f32 %v1809_v22, %v1749_v57  ;;  %v1811_v36 = vpop.eup %1810 }
0x1158   :  { %v528_v32 = vsel %vm165_vm6, %v527_v21, 0.0  ;;  %v437_v61 = vmul.f32 %v1811_v36, %v1749_v57  ;;  %v1813_v63 = vpop.eup %1812 }
0x1159   :  { %v708_v10 = vsel %vm165_vm6, %v707_v23, 0.0  ;;  %v797_v38 = vmul.f32 %v1813_v63, %v1749_v57 }
0x115a   :  { %v438_v37 = vsel %vm165_vm6, %v437_v61, 0.0 }
0x115b   :  { %v798_v0 = vsel %vm165_vm6, %v797_v38, 0.0 }
0x1175   :  { %v259_v48 = vpop.xlane.xlu1 %258 }
0x1176   :  { %v261_v19 = vadd.f32 %v1750_v45, %v259_v48 }
0x117d   :  { %349 = vadd.xlane.f32.xlu2 %v348_v18  ;;  %v620_v5 = vpop.xlane.xlu1 %619 }
0x1185   :  { %529 = vadd.xlane.f32.xlu2 %v528_v32 }
0x118d   :  { %709 = vadd.xlane.f32.xlu2 %v708_v10 }
0x11ae   :  { %v856_v26 = vpop.permute.xlu2 %855 }
0x11af   :  { %v858_v29 = vmul.f32 %v856_v26, %v853_v25 }
0x11b1   :  { %v2207_v30 = vadd.f32 %v859_v27, %v858_v29 }
0x11b3   :  { %862 = vrot.lane.b32.xlu0 %v2207_v30, %s1869_s3 }
0x11dd   :  { %439 = vadd.xlane.f32.xlu0 %v438_v37 }
0x11e5   :  { %799 = vadd.xlane.f32.xlu0 %v798_v0 }
0x11f0   :  { %v350_v44 = vpop.xlane.xlu2 %349 }
0x11f1   :  { %v351_v51 = vadd.f32 %v1750_v45, %v350_v44 }
0x11f3   :  { %v892_v3 = vmax.f32 %v261_v19, %v351_v51 }
0x11f8   :  { %v530_v52 = vpop.xlane.xlu2 %529 }
0x1200   :  { %v710_v58 = vpop.xlane.xlu2 %709 }
0x1201   :  { %v711_v1 = vadd.f32 %v1750_v45, %v710_v58  ;;  %v994_v58 = vld [vmem:[%s2625_s1] sm:$0xff] }
0x1225   :  { %v863_v39 = vpop.permute.xlu0 %862 }
0x1226   :  { %1711 = vmatmul.msk.f32.vlgmr.msrb.gmra.mxu1 %vm165_vm6, %v863_v39 }
0x1250   :  { %v440_v50 = vpop.xlane.xlu0 %439 }
0x1251   :  { %v441_v2 = vadd.f32 %v1750_v45, %v440_v50 }
0x1253   :  { %v893_v53 = vmax.f32 %v892_v3, %v441_v2 }
0x1258   :  { %v800_v62 = vpop.xlane.xlu0 %799 }
0x1259   :  { %v801_v7 = vadd.f32 %v1750_v45, %v800_v62  ;;  %v1049_v62 = vld [vmem:[%s2623_s4 + $0x60] sm:$0xff] }
0x12a3   :  { %v883_v40 = vpop.f32.mrf.mxu1 }
0x12a4   :  { %v884_v41 = vadd.f32 %v1748_v54, %v883_v40  ;;  %v531_v54 = vadd.f32 %v1750_v45, %v530_v52 }
0x12a6   :  { %1814 = vtanh.f32 %v884_v41  ;;  %v894_v56 = vmax.f32 %v893_v53, %v531_v54 }
0x12ac   :  { %v1815_v49 = vpop.eup %1814 }
0x12ad   :  { %v887_v42 = vmul.f32 %v1815_v49, %v1749_v57  ;;  %v621_v57 = vadd.f32 %v1750_v45, %v620_v5  ;;  %v996_v5 = vld [vmem:[%s2623_s4 + $0x40] sm:$0xff] }
0x12ae   :  { %1041 = vmatpush.msrb.mxu3 %v996_v5 }
0x12af   :  { %v888_v43 = vsel %vm165_vm6, %v887_v42, 0.0  ;;  %v895_v59 = vmax.f32 %v894_v56, %v621_v57  ;;  %v995_v56 = vld [vmem:[%s2623_s4 + $0x38] sm:$0xff] }
0x12b0   :  { %889 = vadd.xlane.f32.xlu1 %v888_v43  ;;  %1042 = vmatpush.msrb.mxu3 %v995_v56 }
0x12b1   :  { %v896_v6 = vmax.f32 %v895_v59, %v711_v1  ;;  %v1050_v59 = vld [vmem:[%s2623_s4 + $0x68] sm:$0xff]  ;;  %1713 = vmatmul.msk.f32.vlgmr.msrb.gmra.mxu3 %vm1023_vm14, %v994_v58 }
0x12b2   :  { %1068 = vmatpush.msra.mxu1 %v1050_v59 }
0x12b3   :  { %v897_v33 = vmax.f32 %v896_v6, %v801_v7 }
0x12b4   :  { %1069 = vmatpush.msra.mxu1 %v1049_v62 }
0x1323   :  { %v890_v9 = vpop.xlane.xlu1 %889 }
0x1324   :  { %v891_v8 = vadd.f32 %v1750_v45, %v890_v9 }
0x1326   :  { %v898_v12 = vmax.f32 %v897_v33, %v891_v8 }
0x1328   :  { %v899_v13 = vsub.f32 %v261_v19, %v898_v12  ;;  %v902_v14 = vsub.f32 %v351_v51, %v898_v12  ;;  %v905_v15 = vsub.f32 %v441_v2, %v898_v12  ;;  %v908_v17 = vsub.f32 %v531_v54, %v898_v12  ;;  %v998_v54 = vld [vmem:[%s2623_s4 + $0x48] sm:$0xff] }
0x1329   :  { %v911_v32 = vsub.f32 %v621_v57, %v898_v12  ;;  %v914_v23 = vsub.f32 %v711_v1, %v898_v12  ;;  %v917_v25 = vsub.f32 %v801_v7, %v898_v12  ;;  %v920_v27 = vsub.f32 %v891_v8, %v898_v12  ;;  %1018 = vmatpush.msra.mxu2 %v998_v54  ;;  %v997_v57 = vld [vmem:[%s2624_s2] sm:$0xff]  ;;  %v1048_v1 = vld [vmem:[%s2623_s4 + $0x58] sm:$0xff]  ;;  %v1047_v7 = vld [vmem:[%s2623_s4 + $0x50] sm:$0xff] }
0x132a   :  { %v900_v18 = vmul.f32 1.442695, %v899_v13  ;;  %v903_v20 = vmul.f32 1.442695, %v902_v14  ;;  %v906_v21 = vmul.f32 1.442695, %v905_v15  ;;  %1712 = vmatmul.msk.f32.vlgmr.msra.gmra.mxu2 %vm999_vm13, %v997_v57  ;;  %1070 = vmatpush.msra.mxu1 %v1048_v1 }
0x132b   :  { %v909_v22 = vmul.f32 1.442695, %v908_v17  ;;  %v912_v10 = vmul.f32 1.442695, %v911_v32  ;;  %v915_v26 = vmul.f32 1.442695, %v914_v23 }
0x132c   :  { %1816 = vpow2.f32 %v900_v18  ;;  %v918_v34 = vmul.f32 1.442695, %v917_v25  ;;  %v921_v61 = vmul.f32 1.442695, %v920_v27  ;;  %1071 = vmatpush.msra.mxu1 %v1047_v7 }
0x132d   :  { %1818 = vpow2.f32 %v903_v20 }
0x132e   :  { %1820 = vpow2.f32 %v906_v21 }
0x132f   :  { %1822 = vpow2.f32 %v909_v22 }
0x1330   :  { %1824 = vpow2.f32 %v912_v10 }
0x1331   :  { %1826 = vpow2.f32 %v915_v26 }
0x1332   :  { %v1817_v29 = vpop.eup %1816  ;;  %1828 = vpow2.f32 %v918_v34 }
0x1333   :  { %v1819_v31 = vpop.eup %1818  ;;  %1830 = vpow2.f32 %v921_v61 }
0x1334   :  { %v923_v35 = vadd.f32 %v1819_v31, %v1817_v29  ;;  %v1821_v36 = vpop.eup %1820 }
0x1335   :  { %v1823_v63 = vpop.eup %1822 }
0x1336   :  { %v924_v37 = vadd.f32 %v1821_v36, %v923_v35  ;;  %v1825_v0 = vpop.eup %1824 }
0x1337   :  { %v1827_v40 = vpop.eup %1826 }
0x1338   :  { %v925_v38 = vadd.f32 %v1823_v63, %v924_v37  ;;  %v1829_v49 = vpop.eup %1828 }
0x1339   :  { %v1831_v43 = vpop.eup %1830 }
0x133a   :  { %v926_v39 = vadd.f32 %v1825_v0, %v925_v38 }
0x133c   :  { %v927_v41 = vadd.f32 %v1827_v40, %v926_v39  ;;  %v1874_v39 = vmov 1934713408  }
0x133e   :  { %v928_v42 = vadd.f32 %v1829_v49, %v927_v41 }
0x1340   :  { %v929_v44 = vadd.f32 %v1831_v43, %v928_v42 }
0x1342   :  { %1832 = vrcp.f32 %v929_v44 }
0x1348   :  { %v1833_v45 = vpop.eup %1832 }
0x1349   :  { %v946_v48 = vmul.f32 %v1833_v45, %v1821_v36  ;;  %v938_v50 = vmul.f32 %v1833_v45, %v1819_v31  ;;  %v931_v51 = vmul.f32 %v1833_v45, %v1817_v29  ;;  %v970_v19 = vmul.f32 %v1833_v45, %v1827_v40 }
0x134a   :  { %v954_v2 = vmul.f32 %v1833_v45, %v1823_v63  ;;  %v962_v52 = vmul.f32 %v1833_v45, %v1825_v0  ;;  %v978_v3 = vmul.f32 %v1833_v45, %v1829_v49  ;;  %v986_v53 = vmul.f32 %v1833_v45, %v1831_v43 }
0x134b   :  { %949 = vperm.xlu1 %1746, %v946_v48   ;;  %941 = vperm.xlu0 %1744, %v938_v50   ;;  %v1120_v40 = vunpack.c.l.s4 %v1874_v39 }
0x134c   :  { %934 = vperm.xlu2 %1745, %v931_v51  }
0x1353   :  { %973 = vperm.xlu1 %1746, %v970_v19   ;;  %957 = vperm.xlu0 %1744, %v954_v2  }
0x1354   :  { %965 = vperm.xlu2 %1745, %v962_v52   ;;  %v2269_v52 = vunpack.c.0.s8 %v1120_v40 }
0x135b   :  { %981 = vperm.xlu0 %1744, %v978_v3  }
0x135c   :  { %989 = vperm.xlu2 %1745, %v986_v53  }
0x13a6   :  { %v935_v6 = vpop.permute.xlu2 %934 }
0x13a7   :  { %v937_v12 = vmul.f32 %v935_v6, %v1979_v46 }
0x13ae   :  { %v966_v14 = vpop.permute.xlu2 %965 }
0x13af   :  { %v968_v21 = vmul.f32 %v966_v14, %v2143_v24  ;;  %v1044_v24 = vpop.f32.mrf.mxu3 }
0x13b6   :  { %v990_v25 = vpop.permute.xlu2 %989 }
0x13b7   :  { %v992_v27 = vmul.f32 %v990_v25, %v2207_v30 }
0x13bd   :  { %v942_v9 = vpop.permute.xlu0 %941  ;;  %v950_v8 = vpop.permute.xlu1 %949 }
0x13be   :  { %v944_v33 = vmul.f32 %v942_v9, %v2057_v28  ;;  %v952_v15 = vmul.f32 %v950_v8, %v2086_v4 }
0x13c0   :  { %v945_v13 = vadd.f32 %v944_v33, %v937_v12 }
0x13c2   :  { %v953_v18 = vadd.f32 %v952_v15, %v945_v13 }
0x13c5   :  { %v958_v17 = vpop.permute.xlu0 %957  ;;  %v974_v22 = vpop.permute.xlu1 %973 }
0x13c6   :  { %v960_v20 = vmul.f32 %v958_v17, %v2116_v47  ;;  %v976_v10 = vmul.f32 %v974_v22, %v2166_v55  ;;  %v1020_v47 = vpop.f32.mrf.mxu2  ;;  %v1751_v55 = vld [vmem:[%s2623_s4 + $0x70] ss:$0 sm:$0xff]  ;;  %s1875_s4 = smov 8  }
0x13c7   :  { %v1045_v34 = vadd.f32 %v1044_v24, %v1020_v47 }
0x13c8   :  { %v961_v32 = vadd.f32 %v960_v20, %v953_v18 }
0x13ca   :  { %v969_v23 = vadd.f32 %v968_v21, %v961_v32 }
0x13cc   :  { %v977_v26 = vadd.f32 %v976_v10, %v969_v23 }
0x13cd   :  { %v982_v28 = vpop.permute.xlu0 %981 }
0x13ce   :  { %v984_v46 = vmul.f32 %v982_v28, %v2179_v60  ;;  %v1873_v60 = vmov 1983009808  }
0x13cf   :  { %v1096_v30 = vunpack.c.l.s4 %v1873_v60 }
0x13d0   :  { %v985_v29 = vadd.f32 %v984_v46, %v977_v26 }
0x13d1   :  { %v2261_v63 = vunpack.c.0.s8 %v1096_v30 }
0x13d2   :  { %v993_v4 = vadd.f32 %v992_v27, %v985_v29 }
0x13d4   :  { %1052 = vrot.lane.b32.xlu1 %v993_v4, %s1869_s3 }
0x1446   :  { %v1053_v31 = vpop.permute.xlu1 %1052 }
0x1447   :  { %1714 = vmatmul.msk.f32.vlgmr.msra.gmra.mxu1 %vm165_vm6, %v1053_v31 }
0x14c4   :  { %v1073_v35 = vpop.f32.mrf.mxu1 }
0x14c5   :  { %v1076_v36 = vadd.f32 %v1073_v35, %v1045_v34 }
0x14c7   :  { %v1079_v61 = vadd.f32 %v1751_v55, %v1076_v36 }
0x14c9   :  { %1081 = vrot.lane.b32.xlu1 %v1079_v61, %s1870_s17  ;;  %1087 = vrot.lane.b32.xlu2 %v1079_v61, %s1871_s18  ;;  %v1093_v41 = vrot.slane %v1079_v61, 4 }
0x14ca   :  { %1084 = vrot.lane.b32.xlu0 %v1079_v61, %s1872_s0 }
0x1523   :  { %v1088_v37 = vpop.permute.xlu2 %1087 }
0x1524   :  { %v1103_v38 = vrot.slane %v1088_v37, 4 }
0x153b   :  { %v1082_v0 = vpop.permute.xlu1 %1081 }
0x153c   :  { %v1104_v49 = vsel %vm1091_vm15, %v1103_v38, %v1082_v0  ;;  %v1105_v42 = vrot.slane %v1082_v0, 4  ;;  %v1085_v43 = vpop.permute.xlu0 %1084 }
0x153d   :  { %v1110_v44 = vperm.slane %v1104_v49, %v2261_v63  ;;  %v1090_v45 = vrot.slane %v1085_v43, 4  ;;  %v1094_v48 = vsel %vm1091_vm15, %v1085_v43, %v1093_v41 }
0x153e   :  { %v1106_v50 = vsel %vm1091_vm15, %v1088_v37, %v1105_v42  ;;  %v1102_v51 = vperm.slane %v1094_v48, %v2261_v63 }
0x153f   :  { %v1114_v19 = vperm.slane %v1106_v50, %v2261_v63  ;;  %v1115_v2 = vrot.slane %v1110_v44, 4  ;;  %v1092_v3 = vsel %vm1091_vm15, %v1090_v45, %v1079_v61 }
0x1540   :  { %v1098_v53 = vperm.slane %v1092_v3, %v2261_v63  ;;  %v1129_v54 = vrot.slane %v1102_v51, 4 }
0x1541   :  { %v1127_v58 = vrot.slane %v1114_v19, 4 }
0x1542   :  { %v1116_v5 = vsel %vm1091_vm15, %v1115_v2, %v1098_v53  ;;  %v1117_v56 = vrot.slane %v1098_v53, 4  ;;  %v1130_v57 = vsel %vm1091_vm15, %v1114_v19, %v1129_v54 }
0x1543   :  { %v2276_v59 = vperm.slane %v1130_v57, %v2269_v52  ;;  %v2279_v62 = vperm.slane %v1116_v5, %v2269_v52  ;;  %v1128_v8 = vsel %vm1091_vm15, %v1127_v58, %v1102_v51 }
0x1544   :  { %v1118_v1 = vsel %vm1091_vm15, %v1110_v44, %v1117_v56  ;;  %v2299_v17 = vperm.slane %v1128_v8, %v2269_v52 }
0x1545   :  { %v1166_v6 = vsel %vm1147_vm1, %v2276_v59, -inf  ;;  %v2285_v7 = vperm.slane %v1118_v1, %v2269_v52  ;;  %v1139_v9 = vrot.slane %v2279_v62, 4  ;;  %v1145_v33 = vrot.slane %v2276_v59, 4 }
0x1546   :  { %1167 = vmax.xlane.f32.xlu2 %v1166_v6  ;;  %v1143_v32 = vrot.slane %v2299_v17, 4  ;;  %v1160_v23 = vsel %vm1147_vm1, %v2299_v17, -inf  ;;  %v1148_v28 = vsel %vm1147_vm1, %v2279_v62, -inf }
0x1547   :  { %v1154_v12 = vsel %vm1147_vm1, %v2285_v7, -inf  ;;  %v2293_v13 = vsel %vm1091_vm15, 0.0, %v1139_v9  ;;  %v1141_v15 = vrot.slane %v2285_v7, 4  ;;  %v2302_v18 = vsel %vm1091_vm15, 0.0, %v1145_v33 }
0x1548   :  { %1155 = vmax.xlane.f32.xlu0 %v1154_v12  ;;  %v1151_v14 = vsel %vm1147_vm1, %v2293_v13, -inf  ;;  %v1169_v21 = vsel %vm1147_vm1, %v2302_v18, -inf  ;;  %v2315_v10 = vsel %vm1091_vm15, 0.0, %v1143_v32 }
0x1549   :  { %1152 = vmax.xlane.f32.xlu1 %v1151_v14  ;;  %v2305_v20 = vsel %vm1091_vm15, 0.0, %v1141_v15  ;;  %v1163_v25 = vsel %vm1147_vm1, %v2315_v10, -inf }
0x154a   :  { %v1157_v22 = vsel %vm1147_vm1, %v2305_v20, -inf }
0x154e   :  { %1170 = vmax.xlane.f32.xlu2 %v1169_v21 }
0x1550   :  { %1158 = vmax.xlane.f32.xlu0 %v1157_v22 }
0x1551   :  { %1161 = vmax.xlane.f32.xlu1 %v1160_v23 }
0x1556   :  { %1164 = vmax.xlane.f32.xlu2 %v1163_v25 }
0x1558   :  { %1149 = vmax.xlane.f32.xlu0 %v1148_v28 }
0x15b9   :  { %v2321_v26 = vpop.xlane.xlu2 %1167 }
0x15ba   :  { %v1178_v46 = vsub.f32 %v2276_v59, %v2321_v26 }
0x15bb   :  { %v2325_v27 = vpop.xlane.xlu0 %1155 }
0x15bc   :  { %v1192_v29 = vmul.f32 1.442695, %v1178_v46  ;;  %v1174_v4 = vsub.f32 %v2285_v7, %v2325_v27  ;;  %v2329_v31 = vpop.xlane.xlu1 %1152 }
0x15bd   :  { %v1173_v47 = vsub.f32 %v2293_v13, %v2329_v31 }
0x15be   :  { %1834 = vpow2.f32 %v1192_v29  ;;  %v1184_v24 = vmul.f32 1.442695, %v1174_v4 }
0x15bf   :  { %v1182_v34 = vmul.f32 1.442695, %v1173_v47 }
0x15c0   :  { %1836 = vpow2.f32 %v1184_v24 }
0x15c1   :  { %1838 = vpow2.f32 %v1182_v34  ;;  %v2333_v55 = vpop.xlane.xlu2 %1170 }
0x15c2   :  { %v1179_v35 = vsub.f32 %v2302_v18, %v2333_v55 }
0x15c3   :  { %v2337_v36 = vpop.xlane.xlu0 %1158 }
0x15c4   :  { %v1835_v61 = vpop.eup %1834  ;;  %v1194_v60 = vmul.f32 1.442695, %v1179_v35  ;;  %v1175_v30 = vsub.f32 %v2305_v20, %v2337_v36  ;;  %v2341_v37 = vpop.xlane.xlu1 %1161 }
0x15c5   :  { %v1176_v38 = vsub.f32 %v2299_v17, %v2341_v37  ;;  %v1214_v0 = vsel %vm1147_vm1, %v1835_v61, 0.0 }
0x15c6   :  { %v1837_v39 = vpop.eup %1836  ;;  %1840 = vpow2.f32 %v1194_v60  ;;  %v1186_v40 = vmul.f32 1.442695, %v1175_v30  ;;  %1215 = vadd.xlane.f32.xlu0 %v1214_v0 }
0x15c7   :  { %v1839_v41 = vpop.eup %1838  ;;  %v1188_v49 = vmul.f32 1.442695, %v1176_v38  ;;  %v1202_v42 = vsel %vm1147_vm1, %v1837_v39, 0.0 }
0x15c8   :  { %1842 = vpow2.f32 %v1186_v40  ;;  %1203 = vadd.xlane.f32.xlu1 %v1202_v42  ;;  %v1199_v43 = vsel %vm1147_vm1, %v1839_v41, 0.0 }
0x15c9   :  { %1844 = vpow2.f32 %v1188_v49  ;;  %1200 = vadd.xlane.f32.xlu2 %v1199_v43  ;;  %v2348_v44 = vpop.xlane.xlu2 %1164 }
0x15ca   :  { %v1177_v45 = vsub.f32 %v2315_v10, %v2348_v44 }
0x15cb   :  { %v2352_v48 = vpop.xlane.xlu0 %1149 }
0x15cc   :  { %v1841_v50 = vpop.eup %1840  ;;  %v1190_v51 = vmul.f32 1.442695, %v1177_v45  ;;  %v1172_v19 = vsub.f32 %v2279_v62, %v2352_v48 }
0x15cd   :  { %v1217_v2 = vsel %vm1147_vm1, %v1841_v50, 0.0 }
0x15ce   :  { %v1843_v3 = vpop.eup %1842  ;;  %1846 = vpow2.f32 %v1190_v51  ;;  %v1180_v53 = vmul.f32 1.442695, %v1172_v19  ;;  %1218 = vadd.xlane.f32.xlu0 %v1217_v2 }
0x15cf   :  { %v1845_v54 = vpop.eup %1844  ;;  %v1205_v5 = vsel %vm1147_vm1, %v1843_v3, 0.0 }
0x15d0   :  { %1848 = vpow2.f32 %v1180_v53  ;;  %1206 = vadd.xlane.f32.xlu1 %v1205_v5  ;;  %v1208_v56 = vsel %vm1147_vm1, %v1845_v54, 0.0 }
0x15d1   :  { %1209 = vadd.xlane.f32.xlu2 %v1208_v56 }
0x15d4   :  { %v1847_v57 = vpop.eup %1846 }
0x15d5   :  { %v1211_v58 = vsel %vm1147_vm1, %v1847_v57, 0.0 }
0x15d6   :  { %v1849_v1 = vpop.eup %1848  ;;  %1212 = vadd.xlane.f32.xlu0 %v1211_v58 }
0x15d7   :  { %v1196_v6 = vsel %vm1147_vm1, %v1849_v1, 0.0 }
0x15d8   :  { %1197 = vadd.xlane.f32.xlu1 %v1196_v6 }
0x1639   :  { %v1216_v9 = vpop.xlane.xlu0 %1215 }
0x163a   :  { %1850 = vlog2.f32 %v1216_v9 }
0x163b   :  { %v1204_v33 = vpop.xlane.xlu1 %1203 }
0x163c   :  { %1852 = vlog2.f32 %v1204_v33  ;;  %v1201_v8 = vpop.xlane.xlu2 %1200 }
0x163d   :  { %1854 = vlog2.f32 %v1201_v8 }
0x1640   :  { %v1851_v12 = vpop.eup %1850 }
0x1641   :  { %v1233_v14 = vmul.f32 0.6931472, %v1851_v12  ;;  %v1219_v15 = vpop.xlane.xlu0 %1218 }
0x1642   :  { %v1853_v21 = vpop.eup %1852  ;;  %1856 = vlog2.f32 %v1219_v15 }
0x1643   :  { %v1855_v32 = vpop.eup %1854  ;;  %v1242_v22 = vadd.f32 %v1233_v14, %v2321_v26  ;;  %v1225_v23 = vmul.f32 0.6931472, %v1853_v21  ;;  %v1207_v25 = vpop.xlane.xlu1 %1206 }
0x1644   :  { %v1223_v28 = vmul.f32 0.6931472, %v1855_v32  ;;  %1858 = vlog2.f32 %v1207_v25  ;;  %v1210_v46 = vpop.xlane.xlu2 %1209 }
0x1645   :  { %v1238_v29 = vadd.f32 %v1225_v23, %v2325_v27  ;;  %1860 = vlog2.f32 %v1210_v46  ;;  %v2364_v4 = vsub.f32 %v2276_v59, %v1242_v22 }
0x1646   :  { %v1237_v47 = vadd.f32 %v1223_v28, %v2329_v31 }
0x1647   :  { %v1270_v24 = vsel %vm1147_vm1, %v2364_v4, -inf  ;;  %v2370_v34 = vsub.f32 %v2285_v7, %v1238_v29  ;;  %v1579_v43 = vrot.slane %v2364_v4, 4 }
0x1648   :  { %v1857_v26 = vpop.eup %1856  ;;  %1271 = vmax.xlane.f32.xlu1 %v1270_v24  ;;  %v2376_v0 = vsub.f32 %v2293_v13, %v1237_v47 }
0x1649   :  { %v1235_v35 = vmul.f32 0.6931472, %v1857_v26  ;;  %v1213_v61 = vpop.xlane.xlu0 %1212  ;;  %v1258_v60 = vsel %vm1147_vm1, %v2370_v34, -inf  ;;  %v1567_v5 = vrot.slane %v2370_v34, 4 }
0x164a   :  { %v1859_v27 = vpop.eup %1858  ;;  %1862 = vlog2.f32 %v1213_v61  ;;  %1259 = vmax.xlane.f32.xlu0 %v1258_v60  ;;  %v1255_v49 = vsel %vm1147_vm1, %v2376_v0, -inf }
0x164b   :  { %v1861_v59 = vpop.eup %1860  ;;  %v1243_v30 = vadd.f32 %v1235_v35, %v2333_v55  ;;  %v1227_v31 = vmul.f32 0.6931472, %v1859_v27  ;;  %v1198_v38 = vpop.xlane.xlu1 %1197 }
0x164c   :  { %v1229_v7 = vmul.f32 0.6931472, %v1861_v59  ;;  %1864 = vlog2.f32 %v1198_v38 }
0x164d   :  { %v1239_v39 = vadd.f32 %v1227_v31, %v2337_v36  ;;  %v2380_v40 = vsub.f32 %v2302_v18, %v1243_v30 }
0x164e   :  { %v1240_v41 = vadd.f32 %v1229_v7, %v2341_v37 }
0x164f   :  { %v2386_v42 = vsub.f32 %v2305_v20, %v1239_v39  ;;  %v1273_v18 = vsel %vm1147_vm1, %v2380_v40, -inf  ;;  %v1585_v3 = vrot.slane %v2380_v40, 4 }
0x1650   :  { %v1863_v55 = vpop.eup %1862  ;;  %1256 = vmax.xlane.f32.xlu1 %v1255_v49  ;;  %v2390_v13 = vsub.f32 %v2299_v17, %v1240_v41 }
0x1651   :  { %v1231_v45 = vmul.f32 0.6931472, %v1863_v55  ;;  %v1573_v36 = vrot.slane %v2386_v42, 4  ;;  %v1261_v46 = vsel %vm1147_vm1, %v2386_v42, -inf }
0x1652   :  { %v1865_v37 = vpop.eup %1864  ;;  %1274 = vmax.xlane.f32.xlu0 %v1273_v18  ;;  %v1580_v50 = vsel %vm1091_vm15, %v1579_v43, %v2390_v13  ;;  %v1264_v35 = vsel %vm1147_vm1, %v2390_v13, -inf }
0x1653   :  { %v1241_v20 = vadd.f32 %v1231_v45, %v2348_v44  ;;  %v1221_v51 = vmul.f32 0.6931472, %v1865_v37  ;;  %v1574_v19 = vsel %vm1091_vm15, %v1573_v36, %v2376_v0  ;;  %v1584_v17 = vperm.slane %v1580_v50, %v2261_v63 }
0x1654   :  { %v1578_v54 = vperm.slane %v1574_v19, %v2261_v63 }
0x1655   :  { %v1236_v2 = vadd.f32 %v1221_v51, %v2352_v48  ;;  %v2404_v53 = vsub.f32 %v2315_v10, %v1241_v20  ;;  %v1605_v58 = vrot.slane %v1584_v17, 4 }
0x1656   :  { %v1591_v9 = vrot.slane %v1578_v54, 4 }
0x1657   :  { %v1267_v44 = vsel %vm1147_vm1, %v2404_v53, -inf  ;;  %v1586_v56 = vsel %vm1091_vm15, %v1585_v3, %v2404_v53  ;;  %v2413_v57 = vsub.f32 %v2279_v62, %v1236_v2 }
0x1658   :  { %v1590_v48 = vperm.slane %v1586_v56, %v2261_v63  ;;  %1268 = vmax.xlane.f32.xlu1 %v1267_v44 }
0x1659   :  { %v1252_v10 = vsel %vm1147_vm1, %v2413_v57, -inf  ;;  %v1568_v1 = vsel %vm1091_vm15, %v1567_v5, %v2413_v57 }
0x165a   :  { %v1572_v6 = vperm.slane %v1568_v1, %v2261_v63  ;;  %1253 = vmax.xlane.f32.xlu2 %v1252_v10  ;;  %v1603_v33 = vrot.slane %v1590_v48, 4  ;;  %v1606_v8 = vsel %vm1091_vm15, %v1590_v48, %v1605_v58 }
0x165b   :  { %v1614_v62 = vperm.slane %v1606_v8, %v2269_v52 }
0x165c   :  { %v1593_v12 = vrot.slane %v1572_v6, 4  ;;  %v1592_v14 = vsel %vm1091_vm15, %v1591_v9, %v1572_v6  ;;  %v1604_v15 = vsel %vm1091_vm15, %v1603_v33, %v1584_v17 }
0x165d   :  { %v2426_v21 = vperm.slane %v1604_v15, %v2269_v52  ;;  %v2430_v22 = vperm.slane %v1592_v14, %v2269_v52  ;;  %v1619_v28 = vrot.slane %v1614_v62, 4 }
0x165e   :  { %v1594_v32 = vsel %vm1091_vm15, %v1578_v54, %v1593_v12 }
0x165f   :  { %v1615_v23 = vrot.slane %v2426_v21, 4  ;;  %v1602_v25 = vperm.slane %v1594_v32, %v2269_v52 }
0x1661   :  { %v2438_v29 = vsel %vm1091_vm15, %v1615_v23, %v2430_v22  ;;  %v1621_v47 = vrot.slane %v1602_v25, 4  ;;  %v2441_v24 = vsel %vm1091_vm15, %v1619_v28, %v1602_v25 }
0x1662   :  { %1262 = vmax.xlane.f32.xlu2 %v1261_v46 }
0x1663   :  { %v2444_v26 = vsel %vm1091_vm15, %v1614_v62, %v1621_v47 }
0x166a   :  { %1265 = vmax.xlane.f32.xlu2 %v1264_v35 }
0x16bb   :  { %v1272_v61 = vpop.xlane.xlu1 %1271 }
0x16bc   :  { %vm1282_vm2 = vcmp.ge.f32.partialorder %v2364_v4, %v1272_v61  ;;  %v1479_v33 = vsel %vm1436_vm4, %v1272_v61, 0.0 }
0x16bd   :  { %v1290_v60 = vsel %vm1282_vm2, %v1965_v16, 8  ;;  %v1260_v27 = vpop.xlane.xlu0 %1259  ;;  %v1480_v25 = vrot.slane %v1479_v33, 4  ;;  %vm1656_vm2 = vcmask 1043459  }
0x16be   :  { %vm1278_vm3 = vcmp.ge.f32.partialorder %v2370_v34, %v1260_v27  ;;  %v2452_v59 = vsel %vm1147_vm1, %v1290_v60, 2147483647  ;;  %v1451_v39 = vsel %vm1436_vm4, %v1260_v27, 0.0 }
0x16bf   :  { %v1286_v30 = vsel %vm1278_vm3, %v1965_v16, 8  ;;  %v1384_v31 = vshra.s32 %v2452_v59, 16  ;;  %v1452_v55 = vrot.slane %v1451_v39, 4  ;;  %vm1658_vm3 = vcmask 1044484  }
0x16c0   :  { %v2457_v38 = vsel %vm1147_vm1, %v1286_v30, 2147483647 }
0x16c1   :  { %v2459_v7 = vcvt.s32.f32 %v1384_v31  ;;  %v1324_v4 = vshra.s32 %v2457_v38, 16  ;;  %v1453_v45 = vadd.f32 %v1452_v55, %v1451_v39  ;;  %v1481_v39 = vadd.f32 %v1480_v25, %v1479_v33 }
0x16c3   :  { %1387 = vmin.xlane.f32.xlu0 %v2459_v7  ;;  %v2464_v34 = vpop.xlane.xlu1 %1256  ;;  %v2466_v41 = vcvt.s32.f32 %v1324_v4  ;;  %v1454_v50 = vrot.slane %v1453_v45, 2 }
0x16c4   :  { %v1444_v49 = vsel %vm1436_vm4, %v2464_v34, 0.0  ;;  %vm1277_vm11 = vcmp.ge.f32.partialorder %v2376_v0, %v2464_v34 }
0x16c5   :  { %v1445_v43 = vrot.slane %v1444_v49, 4  ;;  %1327 = vmin.xlane.f32.xlu2 %v2466_v41  ;;  %v2471_v36 = vpop.xlane.xlu0 %1274 }
0x16c6   :  { %vm1283_vm5 = vcmp.ge.f32.partialorder %v2380_v40, %v2471_v36  ;;  %v1455_v40 = vadd.f32 %v1454_v50, %v1453_v45 }
0x16c7   :  { %v1446_v18 = vadd.f32 %v1445_v43, %v1444_v49 }
0x16c8   :  { %v1456_v8 = vrot.slane %v1455_v40, 1 }
0x16c9   :  { %v1447_v20 = vrot.slane %v1446_v18, 2 }
0x16cb   :  { %v1269_v37 = vpop.xlane.xlu1 %1268  ;;  %v1448_v56 = vadd.f32 %v1447_v20, %v1446_v18 }
0x16cc   :  { %vm1281_vm0 = vcmp.ge.f32.partialorder %v2404_v53, %v1269_v37  ;;  %v1291_v53 = vsel %vm1283_vm5, %v1965_v16, 8  ;;  %v1472_v10 = vsel %vm1436_vm4, %v1269_v37, 0.0  ;;  %vm1662_vm5 = vcmask 1046534  }
0x16cd   :  { %v1289_v51 = vsel %vm1281_vm0, %v1965_v16, 8  ;;  %v1254_v19 = vpop.xlane.xlu2 %1253  ;;  %v2495_v9 = vsel %vm1147_vm1, %v1291_v53, 2147483647  ;;  %v1449_v62 = vrot.slane %v1448_v56, 1  ;;  %v1473_v15 = vrot.slane %v1472_v10, 4 }
0x16ce   :  { %vm1276_vm7 = vcmp.ge.f32.partialorder %v2413_v57, %v1254_v19  ;;  %v1437_v17 = vsel %vm1436_vm4, %v1254_v19, 0.0  ;;  %v2480_v2 = vsel %vm1147_vm1, %v1289_v51, 2147483647  ;;  %v1399_v23 = vshra.s32 %v2495_v9, 16 }
0x16cf   :  { %v1284_v3 = vsel %vm1276_vm7, %v1965_v16, 8  ;;  %v1438_v54 = vrot.slane %v1437_v17, 4  ;;  %v1369_v5 = vshra.s32 %v2480_v2, 16  ;;  %v1450_v61 = vadd.f32 %v1449_v62, %v1448_v56 }
0x16d0   :  { %v2486_v44 = vsel %vm1147_vm1, %v1284_v3, 2147483647  ;;  %v1474_v31 = vadd.f32 %v1473_v15, %v1472_v10  ;;  %v2508_v4 = vcvt.s32.f32 %v1399_v23  ;;  %v1482_v51 = vrot.slane %v1481_v39, 2 }
0x16d1   :  { %v1439_v48 = vadd.f32 %v1438_v54, %v1437_v17  ;;  %v1294_v57 = vshra.s32 %v2486_v44, 16  ;;  %v2489_v58 = vcvt.s32.f32 %v1369_v5  ;;  %v1285_v53 = vsel %vm1277_vm11, %v1965_v16, 8 }
0x16d2   :  { %v1475_v50 = vrot.slane %v1474_v31, 2  ;;  %v1483_v0 = vadd.f32 %v1482_v51, %v1481_v39  ;;  %v2522_v10 = vsel %vm1147_vm1, %v1285_v53, 2147483647  ;;  %vm1660_vm0 = vcmask 1045509  }
0x16d3   :  { %v1440_v1 = vrot.slane %v1439_v48, 2  ;;  %v2492_v6 = vcvt.s32.f32 %v1294_v57  ;;  %1372 = vmin.xlane.f32.xlu2 %v2489_v58 }
0x16d5   :  { %v1441_v12 = vadd.f32 %v1440_v1, %v1439_v48  ;;  %1297 = vmin.xlane.f32.xlu0 %v2492_v6  ;;  %v1263_v14 = vpop.xlane.xlu2 %1262  ;;  %v1476_v48 = vadd.f32 %v1475_v50, %v1474_v31 }
0x16d6   :  { %vm1279_vm8 = vcmp.ge.f32.partialorder %v2386_v42, %v1263_v14  ;;  %v1458_v32 = vsel %vm1436_vm4, %v1263_v14, 0.0  ;;  %v1457_v42 = vadd.f32 %v1456_v8, %v1455_v40  ;;  %v1484_v8 = vrot.slane %v1483_v0, 1 }
0x16d7   :  { %v1442_v28 = vrot.slane %v1441_v12, 1  ;;  %v1287_v46 = vsel %vm1279_vm8, %v1965_v16, 8  ;;  %v1459_v47 = vrot.slane %v1458_v32, 4  ;;  %v1477_v33 = vrot.slane %v1476_v48, 1 }
0x16d8   :  { %v2505_v35 = vsel %vm1147_vm1, %v1287_v46, 2147483647 }
0x16d9   :  { %v1443_v60 = vadd.f32 %v1442_v28, %v1441_v12  ;;  %v1460_v27 = vadd.f32 %v1459_v47, %v1458_v32  ;;  %v1339_v30 = vshra.s32 %v2505_v35, 16  ;;  %v1309_v12 = vshra.s32 %v2522_v10, 16 }
0x16da   :  { %v1478_v15 = vadd.f32 %v1477_v33, %v1476_v48  ;;  %v1485_v32 = vadd.f32 %v1484_v8, %v1483_v0  ;;  %v1383_v47 = vand.u32 65535, %v2452_v59  ;;  %v1293_v59 = vand.u32 65535, %v2486_v44 }
0x16db   :  { %v1653_v49 = vsel %vm1652_vm9, %v1450_v61, %v1443_v60  ;;  %v1461_v55 = vrot.slane %v1460_v27, 2  ;;  %v2510_v43 = vcvt.s32.f32 %v1339_v30  ;;  %1402 = vmin.xlane.f32.xlu2 %v2508_v4  ;;  %v1311_v25 = vcvt.s32.f32 %v1309_v12 }
0x16dc   :  { %v1655_v45 = vsel %vm1654_vm10, %v1457_v42, %v1653_v49  ;;  %v1385_v60 = vcvt.s32.f32 %v1383_v47  ;;  %v1323_v42 = vand.u32 65535, %v2457_v38  ;;  %v1368_v49 = vand.u32 65535, %v2480_v2 }
0x16dd   :  { %v1462_v18 = vadd.f32 %v1461_v55, %v1460_v27  ;;  %1342 = vmin.xlane.f32.xlu0 %v2510_v43  ;;  %v1266_v37 = vpop.xlane.xlu2 %1265 }
0x16de   :  { %vm1280_vm12 = vcmp.ge.f32.partialorder %v2390_v13, %v1266_v37  ;;  %v1465_v20 = vsel %vm1436_vm4, %v1266_v37, 0.0  ;;  %v1325_v31 = vcvt.s32.f32 %v1323_v42 }
0x16df   :  { %v1463_v19 = vrot.slane %v1462_v18, 1  ;;  %v1288_v17 = vsel %vm1280_vm12, %v1965_v16, 8  ;;  %v1466_v3 = vrot.slane %v1465_v20, 4 }
0x16e0   :  { %v1352_v54 = vsel %vm1147_vm1, %v1288_v17, 2147483647  ;;  %v1398_v17 = vand.u32 65535, %v2495_v9 }
0x16e1   :  { %v1464_v5 = vadd.f32 %v1463_v19, %v1462_v18  ;;  %v1467_v40 = vadd.f32 %v1466_v3, %v1465_v20  ;;  %v1354_v56 = vshra.s32 %v1352_v54, 16  ;;  %v1353_v20 = vand.u32 65535, %v1352_v54 }
0x16e3   :  { %v1657_v34 = vsel %vm1656_vm2, %v1464_v5, %v1655_v45  ;;  %v1468_v57 = vrot.slane %v1467_v40, 2  ;;  %v1356_v13 = vcvt.s32.f32 %v1354_v56  ;;  %v1370_v45 = vcvt.s32.f32 %v1368_v49 }
0x16e4   :  { %v1617_v5 = vrot.slane %v2430_v22, 4 }
0x16e5   :  { %v1469_v1 = vadd.f32 %v1468_v57, %v1467_v40  ;;  %1357 = vmin.xlane.f32.xlu1 %v1356_v13 }
0x16e6   :  { %v1618_v40 = vsel %vm1091_vm15, %v2426_v21, %v1617_v5 }
0x16e7   :  { %v1470_v62 = vrot.slane %v1469_v1, 1 }
0x16e9   :  { %v1471_v14 = vadd.f32 %v1470_v62, %v1469_v1 }
0x16eb   :  { %v1659_v23 = vsel %vm1658_vm3, %v1471_v14, %v1657_v34 }
0x16ec   :  { %v1661_v28 = vsel %vm1660_vm0, %v1478_v15, %v1659_v23 }
0x16ed   :  { %1312 = vmin.xlane.f32.xlu1 %v1311_v25  ;;  %v2525_v46 = vsel %vm1662_vm5, %v1485_v32, %v1661_v28 }
0x1736   :  { %v2528_v61 = vpop.xlane.xlu0 %1387 }
0x1737   :  { %vm1389_vm1 = vcmp.eq.f32.partialorder %v2459_v7, %v2528_v61  ;;  %v1295_v7 = vcvt.s32.f32 %v1293_v59  ;;  %v1394_v8 = vcvt.f32.s32 %v2528_v61 }
0x1738   :  { %v1390_v27 = vsel %vm1389_vm1, %v1385_v60, inf  ;;  %v1328_v30 = vpop.xlane.xlu2 %1327 }
0x1739   :  { %1391 = vmin.xlane.f32.xlu1 %v1390_v27  ;;  %vm1329_vm7 = vcmp.eq.f32.partialorder %v2466_v41, %v1328_v30  ;;  %v1338_v41 = vand.u32 65535, %v2505_v35  ;;  %v1400_v35 = vcvt.s32.f32 %v1398_v17  ;;  %v1395_v32 = vshll.u32 %v1394_v8, 16 }
0x173a   :  { %v1330_v39 = vsel %vm1329_vm7, %v1325_v31, inf }
0x173b   :  { %v1340_v2 = vcvt.s32.f32 %v1338_v41 }
0x1741   :  { %1331 = vmin.xlane.f32.xlu1 %v1330_v39 }
0x1746   :  { %v2536_v55 = vpop.xlane.xlu2 %1372 }
0x1747   :  { %vm1374_vm8 = vcmp.eq.f32.partialorder %v2489_v58, %v2536_v55  ;;  %v1355_v58 = vcvt.s32.f32 %v1353_v20  ;;  %v1379_v61 = vcvt.f32.s32 %v2536_v55 }
0x1748   :  { %v1298_v18 = vpop.xlane.xlu0 %1297  ;;  %v1375_v37 = vsel %vm1374_vm8, %v1370_v45, inf }
0x1749   :  { %vm1299_vm9 = vcmp.eq.f32.partialorder %v2492_v6, %v1298_v18  ;;  %1376 = vmin.xlane.f32.xlu1 %v1375_v37 }
0x174a   :  { %v1300_v38 = vsel %vm1299_vm9, %v1295_v7, inf  ;;  %v1380_v7 = vshll.u32 %v1379_v61, 16 }
0x174b   :  { %1301 = vmin.xlane.f32.xlu2 %v1300_v38 }
0x174e   :  { %v1403_v6 = vpop.xlane.xlu2 %1402 }
0x174f   :  { %vm1404_vm12 = vcmp.eq.f32.partialorder %v2508_v4, %v1403_v6  ;;  %v1334_v4 = vcvt.f32.s32 %v1328_v30  ;;  %v1409_v31 = vcvt.f32.s32 %v1403_v6 }
0x1750   :  { %v2542_v50 = vpop.xlane.xlu0 %1342  ;;  %v1405_v3 = vsel %vm1404_vm12, %v1400_v35, inf  ;;  %vm1667_vm12 = vcmask 531968  }
0x1751   :  { %vm1344_vm10 = vcmp.eq.f32.partialorder %v2510_v43, %v2542_v50  ;;  %v1308_v43 = vand.u32 65535, %v2522_v10  ;;  %v1335_v34 = vshll.u32 %v1334_v4, 16  ;;  %v1349_v49 = vcvt.f32.s32 %v2542_v50 }
0x1752   :  { %v1345_v44 = vsel %vm1344_vm10, %v1340_v2, inf  ;;  %v1410_v2 = vshll.u32 %v1409_v31, 16 }
0x1753   :  { %1346 = vmin.xlane.f32.xlu2 %v1345_v44  ;;  %v1310_v54 = vcvt.s32.f32 %v1308_v43  ;;  %v1350_v44 = vshll.u32 %v1349_v49, 16 }
0x1758   :  { %v1358_v51 = vpop.xlane.xlu1 %1357 }
0x1759   :  { %vm1359_vm11 = vcmp.eq.f32.partialorder %v1356_v13, %v1358_v51  ;;  %v1304_v13 = vcvt.f32.s32 %v1298_v18 }
0x175a   :  { %v1360_v19 = vsel %vm1359_vm11, %v1355_v58, inf  ;;  %vm1564_vm11 = vcmask 195584  }
0x175b   :  { %1361 = vmin.xlane.f32.xlu0 %v1360_v19  ;;  %v1305_v10 = vshll.u32 %v1304_v13, 16 }
0x1760   :  { %v2548_v53 = vpop.xlane.xlu1 %1312 }
0x1761   :  { %vm1314_vm2 = vcmp.eq.f32.partialorder %v1311_v25, %v2548_v53  ;;  %v1364_v25 = vcvt.f32.s32 %v1358_v51  ;;  %v1319_v19 = vcvt.f32.s32 %v2548_v53 }
0x1762   :  { %v1315_v56 = vsel %vm1314_vm2, %v1310_v54, inf }
0x1763   :  { %1406 = vmin.xlane.f32.xlu0 %v1405_v3  ;;  %v1365_v47 = vshll.u32 %v1364_v25, 16  ;;  %v1320_v43 = vshll.u32 %v1319_v19, 16 }
0x176b   :  { %1624 = vrot.lane.b32.xlu2 %v1618_v40, %s1875_s4  ;;  %1316 = vmin.xlane.f32.xlu0 %v1315_v56 }
0x17ac   :  { %v1392_v9 = vpop.xlane.xlu1 %1391 }
0x17ad   :  { %v1393_v14 = vcvt.f32.s32 %v1392_v9 }
0x17af   :  { %v1396_v23 = vadd.s32 %v1395_v32, %v1393_v14 }
0x17b1   :  { %vm1418_vm5 = vcmp.eq.s32.totalorder %v1965_v16, %v1396_v23 }
0x17b2   :  { %v1721_v27 = vsel %vm1418_vm5, 1.0, %v1867_v11 }
0x17b3   :  { %v1506_v59 = vrot.slane %v1721_v27, 4 }
0x17b4   :  { %v1332_v48 = vpop.xlane.xlu1 %1331 }
0x17b5   :  { %v1333_v0 = vcvt.f32.s32 %v1332_v48 }
0x17b7   :  { %v1336_v57 = vadd.s32 %v1335_v34, %v1333_v0 }
0x17b9   :  { %vm1414_vm3 = vcmp.eq.s32.totalorder %v1965_v16, %v1336_v57 }
0x17ba   :  { %v1717_v33 = vsel %vm1414_vm3, 1.0, %v1867_v11 }
0x17bb   :  { %v1494_v62 = vrot.slane %v1717_v33, 4 }
0x17bc   :  { %v1377_v30 = vpop.xlane.xlu1 %1376 }
0x17bd   :  { %v1378_v45 = vcvt.f32.s32 %v1377_v30 }
0x17be   :  { %v1302_v22 = vpop.xlane.xlu2 %1301 }
0x17bf   :  { %v1303_v1 = vcvt.f32.s32 %v1302_v22  ;;  %v1381_v20 = vadd.s32 %v1380_v7, %v1378_v45  ;;  %v1486_v45 = vsel %vm1436_vm4, %v2471_v36, 0.0 }
0x17c1   :  { %v1306_v21 = vadd.s32 %v1305_v10, %v1303_v1  ;;  %vm1417_vm7 = vcmp.eq.s32.totalorder %v1965_v16, %v1381_v20 }
0x17c2   :  { %v1720_v35 = vsel %vm1417_vm7, 1.0, %v1867_v11 }
0x17c3   :  { %vm1412_vm0 = vcmp.eq.s32.totalorder %v1965_v16, %v1306_v21 }
0x17c4   :  { %v1715_v12 = vsel %vm1412_vm0, 1.0, %v1867_v11 }
0x17c5   :  { %v1495_v15 = vsel %vm1091_vm15, %v1494_v62, %v1715_v12 }
0x17c6   :  { %v1347_v39 = vpop.xlane.xlu2 %1346  ;;  %v1499_v4 = vperm.slane %v1495_v15, %v2261_v63 }
0x17c7   :  { %v1348_v37 = vcvt.f32.s32 %v1347_v39 }
0x17c8   :  { %v1520_v1 = vrot.slane %v1499_v4, 4 }
0x17c9   :  { %v1351_v51 = vadd.s32 %v1350_v44, %v1348_v37 }
0x17cb   :  { %vm1415_vm9 = vcmp.eq.s32.totalorder %v1965_v16, %v1351_v51 }
0x17cc   :  { %v1718_v53 = vsel %vm1415_vm9, 1.0, %v1867_v11 }
0x17cd   :  { %v1500_v34 = vrot.slane %v1718_v53, 4 }
0x17ce   :  { %v1362_v28 = vpop.xlane.xlu0 %1361 }
0x17cf   :  { %v1363_v60 = vcvt.f32.s32 %v1362_v28 }
0x17d1   :  { %v1366_v42 = vadd.s32 %v1365_v47, %v1363_v60  ;;  %v1625_v60 = vpop.permute.xlu2 %1624 }
0x17d3   :  { %vm1416_vm1 = vcmp.eq.s32.totalorder %v1965_v16, %v1366_v42 }
0x17d4   :  { %v1719_v18 = vsel %vm1416_vm1, 1.0, %v1867_v11 }
0x17d5   :  { %v1507_v38 = vsel %vm1091_vm15, %v1506_v59, %v1719_v18  ;;  %v1487_v18 = vrot.slane %v1486_v45, 4 }
0x17d6   :  { %v1407_v41 = vpop.xlane.xlu0 %1406  ;;  %v1511_v50 = vperm.slane %v1507_v38, %v2261_v63 }
0x17d7   :  { %v1408_v55 = vcvt.f32.s32 %v1407_v41  ;;  %v1488_v7 = vadd.f32 %v1487_v18, %v1486_v45 }
0x17d8   :  { %v1532_v40 = vrot.slane %v1511_v50, 4 }
0x17d9   :  { %v1411_v58 = vadd.s32 %v1410_v2, %v1408_v55  ;;  %v1489_v37 = vrot.slane %v1488_v7, 2 }
0x17db   :  { %vm1419_vm8 = vcmp.eq.s32.totalorder %v1965_v16, %v1411_v58  ;;  %v1490_v38 = vadd.f32 %v1489_v37, %v1488_v7 }
0x17dc   :  { %v1722_v6 = vsel %vm1419_vm8, 1.0, %v1867_v11 }
0x17dd   :  { %v1512_v17 = vrot.slane %v1722_v6, 4  ;;  %v1491_v41 = vrot.slane %v1490_v38, 1 }
0x17de   :  { %v1317_v3 = vpop.xlane.xlu0 %1316 }
0x17df   :  { %v1513_v5 = vsel %vm1091_vm15, %v1512_v17, %v1720_v35  ;;  %v1318_v54 = vcvt.f32.s32 %v1317_v3  ;;  %v1492_v2 = vadd.f32 %v1491_v41, %v1490_v38 }
0x17e0   :  { %v1517_v56 = vperm.slane %v1513_v5, %v2261_v63 }
0x17e1   :  { %v1321_v9 = vadd.s32 %v1320_v43, %v1318_v54 }
0x17e2   :  { %v1533_v48 = vsel %vm1091_vm15, %v1517_v56, %v1532_v40  ;;  %v1530_v0 = vrot.slane %v1517_v56, 4 }
0x17e3   :  { %vm1413_vm10 = vcmp.eq.s32.totalorder %v1965_v16, %v1321_v9  ;;  %v1541_v10 = vperm.slane %v1533_v48, %v2269_v52 }
0x17e4   :  { %v1716_v57 = vsel %vm1413_vm10, 1.0, %v1867_v11  ;;  %v1531_v13 = vsel %vm1091_vm15, %v1530_v0, %v1511_v50 }
0x17e5   :  { %v1501_v22 = vsel %vm1091_vm15, %v1500_v34, %v1716_v57  ;;  %v1537_v21 = vperm.slane %v1531_v13, %v2269_v52  ;;  %v1546_v14 = vrot.slane %v1541_v10, 4 }
0x17e6   :  { %v1505_v33 = vperm.slane %v1501_v22, %v2261_v63 }
0x17e7   :  { %v1542_v23 = vrot.slane %v1537_v21, 4 }
0x17e8   :  { %v1518_v8 = vrot.slane %v1505_v33, 4  ;;  %v1521_v62 = vsel %vm1091_vm15, %v1505_v33, %v1520_v1 }
0x17e9   :  { %v1529_v12 = vperm.slane %v1521_v62, %v2269_v52 }
0x17ea   :  { %v1519_v16 = vsel %vm1091_vm15, %v1518_v8, %v1499_v4 }
0x17eb   :  { %v1547_v11 = vsel %vm1091_vm15, %v1546_v14, %v1529_v12  ;;  %v1548_v15 = vrot.slane %v1529_v12, 4  ;;  %v1525_v32 = vperm.slane %v1519_v16, %v2269_v52 }
0x17ec   :  { %1555 = vrot.lane.b32.xlu1 %v1547_v11, %s1876_s20 }
0x17ed   :  { %v1549_v63 = vsel %vm1091_vm15, %v1541_v10, %v1548_v15  ;;  %v1544_v25 = vrot.slane %v1525_v32, 4  ;;  %v1543_v28 = vsel %vm1091_vm15, %v1542_v23, %v1525_v32 }
0x17ee   :  { %1559 = vrot.lane.b32.xlu0 %v1549_v63, %s1877_s22 }
0x17ef   :  { %v1545_v47 = vsel %vm1091_vm15, %v1537_v21, %v1544_v25  ;;  %vm1642_vm15 = vcmask 523520  }
0x17f0   :  { %1551 = vrot.lane.b32.xlu2 %v1545_v47, %s1875_s4 }
0x17f4   :  { %1632 = vrot.lane.b32.xlu1 %v2444_v26, %s1877_s22  ;;  %v1635_v26 = vsel %vm999_vm13, %v2438_v29, %v1625_v60 }
0x17f6   :  { %1628 = vrot.lane.b32.xlu0 %v2441_v24, %s1876_s20 }
0x184a   :  { %v1552_v52 = vpop.permute.xlu2 %1551 }
0x184b   :  { %v1562_v27 = vsel %vm999_vm13, %v1543_v28, %v1552_v52 }
0x185e   :  { %v1556_v30 = vpop.permute.xlu1 %1555 }
0x185f   :  { %v1563_v61 = vsel %vm1023_vm14, %v1562_v27, %v1556_v30 }
0x1860   :  { %v1560_v42 = vpop.permute.xlu0 %1559 }
0x1861   :  { %v1565_v31 = vsel %vm1564_vm11, %v1563_v61, %v1560_v42 }
0x1862   :  { %1566 = vst.msk [vmem:[%s2626_s5] sm:$0xff] %vm165_vm6, %v1565_v31  ;;  %vm1664_vm6 = vcmask 1047559  }
0x1863   :  { %v1665_v44 = vsel %vm1664_vm6, %v1492_v2, %v2525_v46 }
0x1866   :  { %v1633_v24 = vpop.permute.xlu1 %1632 }
0x1868   :  { %v1629_v39 = vpop.permute.xlu0 %1628 }
0x1869   :  { %v1636_v49 = vsel %vm1023_vm14, %v1635_v26, %v1629_v39 }
0x186a   :  { %v1637_v59 = vsel %vm1564_vm11, %v1636_v49, %v1633_v24 }
0x186b   :  { %1639 = vrot.lane.b32.xlu2 %v1637_v59, %s1878_s24 }
0x18c5   :  { %v1640_v29 = vpop.permute.xlu2 %1639 }
0x18c6   :  { %1643 = vst.msk [vmem:[%s2626_s5] sm:$0xff] %vm1642_vm15, %v1640_v29 }
0x18c7   :  { %1668 = vst.msk [vmem:[%s2626_s5] sm:$0xff] %vm1667_vm12, %v1665_v44 }

</bundles_post_ra>
